<compile_context>
chip_gen: v7x
topology: tpu7x:2x2x1
jax: 0.10.0
libtpu: 0.0.40
codegen_flags: <defaults>
</compile_context>

<pallas_src>
import functools

import jax
import jax.numpy as jnp
from jax.experimental import pallas as pl
from jax.experimental.pallas import tpu as pltpu


# ----------------------------------------------------------------------------
# Fused forward kernel
#   refs layout (positional):
#     x_ref                                    (1, B*L)
#     per block (2n blocks): w, bias, gamma, beta
#         w: (Cout, K*Cin), bias/gamma/beta: (Cout, 1)
#     wenc (C_last, latent, L), benc (latent, 1),
#     wdec (latent, C_last, L), bdec (C_last, L)
#     out_ref                                  (B, input_dim, L)
#     scratch: one im2col buffer per block (K*Cin, B*L), plus rec (C_last, B*L)
# ----------------------------------------------------------------------------
def _fused_tcnae_kernel(*refs, blocks, B, L, latent_dim, eps):
    n_blocks = len(blocks)
    n_enc = n_blocks // 2
    C_last = blocks[n_enc - 1][1]
    BL = B * L

    idx = 0
    x_ref = refs[idx]; idx += 1
    blk_refs = []
    for _ in range(n_blocks):
        blk_refs.append(refs[idx:idx + 4]); idx += 4
    wenc_ref, benc_ref, wdec_ref, bdec_ref = refs[idx:idx + 4]; idx += 4
    out_ref = refs[idx]; idx += 1
    cols_refs = refs[idx:idx + n_blocks]; idx += n_blocks
    rec_ref = refs[idx]

    def conv_bn_relu(y, bi):
        """(Cin, B*L) value -> (Cout, B*L) value.  One MXU matmul per block."""
        Cin, Cout, K, d = blocks[bi]
        w_ref, b_ref, g_ref, bt_ref = blk_refs[bi]
        cols_ref = cols_refs[bi]
        pad = (K - 1) * d // 2

        # im2col slab in VMEM scratch; zero init supplies the 'same' padding.
        cols_ref[...] = jnp.zeros_like(cols_ref)
        for k in range(K):
            sr = k * d - pad                       # tap shift relative to t
            t0 = max(0, -sr)
            t1 = min(L, L - sr)
            for b in range(B):
                cols_ref[k * Cin:(k + 1) * Cin,
                         b * L + t0:b * L + t1] = (
                    y[:, b * L + t0 + sr:b * L + t1 + sr])
        cols = cols_ref[...]                        # (K*Cin, B*L)

        if Cin == 1:
            # contraction dim is just K: broadcast-FMA beats a degenerate dot.
            acc = jnp.zeros((Cout, BL), jnp.float32)
            for k in range(K):
                acc = acc + w_ref[:, k:k + 1] * cols[k:k + 1, :]
        else:
            acc = jnp.dot(w_ref[...], cols, preferred_element_type=jnp.float32)
        acc = acc + b_ref[...]                      # conv bias (Cout, 1)

        # BatchNorm1d (training-mode batch stats, biased variance) + ReLU,
        # all on register values; no store/reload of partial results.
        inv_cnt = 1.0 / float(BL)
        mean = jnp.sum(acc, axis=1, keepdims=True) * inv_cnt
        diff = acc - mean
        var = jnp.sum(diff * diff, axis=1, keepdims=True) * inv_cnt
        inv = jax.lax.rsqrt(var + eps)
        yn = diff * (inv * g_ref[...]) + bt_ref[...]
        return jnp.maximum(yn, 0.0)

    # ---------------- encoder ----------------
    y = x_ref[...]                                  # (1, B*L)
    for i in range(n_enc):
        y = conv_bn_relu(y, i)

    # ---- flatten -> fc_enc -> fc_dec -> unflatten, all VMEM-resident ----
    # wenc[c, j, t] = W_enc[j, c*L + t] ; wdec[j, c, t] = W_dec[c*L + t, j]
    for b in range(B):
        # fc_enc: latent[j] = sum_{c,t} W_enc[j, c*L+t] * encoded[c, b*L+t]
        s = jnp.zeros((latent_dim, L), jnp.float32)
        for c in range(C_last):
            s = s + wenc_ref[c, :, :] * y[c:c + 1, b * L:(b + 1) * L]
        lat_b = jnp.sum(s, axis=1, keepdims=True) + benc_ref[...]  # (latent,1)
        # fc_dec: rec[c, t] = sum_j W_dec[c*L+t, j] * latent[j]
        rec_b = bdec_ref[...]                        # (C_last, L)
        for j in range(latent_dim):
            rec_b = rec_b + wdec_ref[j, :, :] * lat_b[j:j + 1, :]
        rec_ref[:, b * L:(b + 1) * L] = rec_b
    y = rec_ref[...]                                 # (C_last, B*L)

    # ---------------- decoder ----------------
    for i in range(n_enc, n_blocks):
        y = conv_bn_relu(y, i)

    # final (input_dim, B*L) -> (B, input_dim, L); single write per batch row.
    for b in range(B):
        out_ref[b, :, :] = y[:, b * L:(b + 1) * L]


# ----------------------------------------------------------------------------
# Parameters (deterministic synthetic init; layouts pre-arranged for the kernel)
# ----------------------------------------------------------------------------
def init_tcnae_params(key, seq_len, input_dim, num_channels, kernel_size,
                      latent_dim):
    assert input_dim == 1, (
        "the module's flatten / fc shapes only line up for input_dim == 1")
    n = len(num_channels)
    K = kernel_size
    L = seq_len
    C_last = num_channels[-1]
    feat = seq_len * C_last * input_dim

    # static per-block config (Cin, Cout, K, dilation): encoder then decoder
    cfg = []
    for i in range(n):
        cin = input_dim if i == 0 else num_channels[i - 1]
        cfg.append((cin, num_channels[i], K, 2 ** i))
    for i in range(n):
        cin = num_channels[-i - 1]
        cout = num_channels[-i - 2] if i < n - 1 else input_dim
        cfg.append((cin, cout, K, 2 ** i))
    cfg = tuple(cfg)
    for (_, _, kk, d) in cfg:
        assert ((kk - 1) * d) % 2 == 0, "symmetric 'same' padding requires even (K-1)*d"

    keys = jax.random.split(key, 2 * n + 2)

    def conv_block(k, cin, cout):
        kw, kb = jax.random.split(k)
        scale = 1.0 / jnp.sqrt(jnp.float32(cin * K))
        w = scale * jax.random.normal(kw, (cout, cin, K), jnp.float32)  # torch layout
        # kernel wants (Cout, K*Cin) with column index k*Cin + ci
        wmat = jnp.transpose(w, (0, 2, 1)).reshape(cout, K * cin)
        return {
            "w": wmat,
            "b": scale * jax.random.normal(kb, (cout, 1), jnp.float32),
            "gamma": jnp.ones((cout, 1), jnp.float32),   # BN affine defaults
            "beta": jnp.zeros((cout, 1), jnp.float32),
        }

    blocks = [conv_block(keys[i], cfg[i][0], cfg[i][1]) for i in range(2 * n)]

    k1, k2 = jax.random.split(keys[2 * n])
    wenc = (1.0 / jnp.sqrt(jnp.float32(feat))) * \
        jax.random.normal(k1, (latent_dim, feat), jnp.float32)
    benc = (1.0 / jnp.sqrt(jnp.float32(feat))) * \
        jax.random.normal(k2, (latent_dim, 1), jnp.float32)
    k3, k4 = jax.random.split(keys[2 * n + 1])
    wdec = (1.0 / jnp.sqrt(jnp.float32(latent_dim))) * \
        jax.random.normal(k3, (feat, latent_dim), jnp.float32)
    bdec = (1.0 / jnp.sqrt(jnp.float32(latent_dim))) * \
        jax.random.normal(k4, (feat,), jnp.float32)

    return {
        "seq_len": seq_len, "input_dim": input_dim,
        "num_channels": list(num_channels), "kernel_size": K,
        "latent_dim": latent_dim, "block_cfg": cfg, "blocks": blocks,
        # fc weights pre-permuted for the (C, B*L) in-kernel layout
        "fc_enc_w3": wenc.reshape(latent_dim, C_last, L).transpose(1, 0, 2),
        "fc_enc_b": benc,
        "fc_dec_w3": wdec.reshape(C_last, L, latent_dim).transpose(2, 0, 1),
        "fc_dec_b2": bdec.reshape(C_last, L),
    }


# ----------------------------------------------------------------------------
# Forward wrapper: one fused pallas_call
# ----------------------------------------------------------------------------
def tcnae_forward(params, x):
    B = x.shape[0]
    L = params["seq_len"]
    blocks_cfg = params["block_cfg"]
    C_last = params["num_channels"][-1]
    latent_dim = params["latent_dim"]

    # x -> (B, 1, L) in the module; in the lane-dense (C=1, B*L) layout this is
    # just a free row-major reshape.
    x2d = x.astype(jnp.float32).reshape(1, B * L)

    args = [x2d]
    for blk in params["blocks"]:
        args += [blk["w"], blk["b"], blk["gamma"], blk["beta"]]
    args += [params["fc_enc_w3"], params["fc_enc_b"],
             params["fc_dec_w3"], params["fc_dec_b2"]]

    vmem = pl.BlockSpec(memory_space=pltpu.MemorySpace.VMEM)
    scratch = [pltpu.VMEM((K * Cin, B * L), jnp.float32)
               for (Cin, _Cout, K, _d) in blocks_cfg]
    scratch.append(pltpu.VMEM((C_last, B * L), jnp.float32))

    kernel = functools.partial(_fused_tcnae_kernel, blocks=blocks_cfg, B=B,
                               L=L, latent_dim=latent_dim, eps=1e-5)
    return pl.pallas_call(
        kernel,
        out_shape=jax.ShapeDtypeStruct((B, params["input_dim"], L), jnp.float32),
        in_specs=[vmem] * len(args),
        out_specs=vmem,
        scratch_shapes=scratch,
    )(*args)


# ----------------------------------------------------------------------------
# Pure-JAX reference (for a correctness check against the fused kernel)
# ----------------------------------------------------------------------------
def _tcnae_reference(params, x):
    B = x.shape[0]
    L = params["seq_len"]
    n = len(params["num_channels"])
    C_last = params["num_channels"][-1]
    latent_dim = params["latent_dim"]
    cfg = params["block_cfg"]

    def block(h, blk, c):
        Cin, Cout, K, d = c
        pad = (K - 1) * d // 2
        hp = jnp.pad(h, ((0, 0), (0, 0), (pad, pad)))
        w = blk["w"].reshape(Cout, K, Cin).transpose(0, 2, 1)   # (Cout, Cin, K)
        out = jnp.zeros((B, Cout, L), jnp.float32)
        for k in range(K):
            xk = hp[:, :, k * d:k * d + L]
            out = out + jnp.einsum('oc,bcl->bol', w[:, :, k], xk)
        out = out + blk["b"].reshape(1, Cout, 1)
        mean = out.mean(axis=(0, 2), keepdims=True)
        var = ((out - mean) ** 2).mean(axis=(0, 2), keepdims=True)
        yn = (out - mean) * jax.lax.rsqrt(var + 1e-5)
        yn = yn * blk["gamma"].reshape(1, Cout, 1) + blk["beta"].reshape(1, Cout, 1)
        return jnp.maximum(yn, 0.0)

    h = x.astype(jnp.float32).reshape(B, 1, L)
    for i in range(n):
        h = block(h, params["blocks"][i], cfg[i])
    enc = h
    flat = enc.reshape(B, -1)
    wenc = params["fc_enc_w3"].transpose(1, 0, 2).reshape(latent_dim, C_last * L)
    lat = flat @ wenc.T + params["fc_enc_b"].reshape(1, -1)
    wdec = params["fc_dec_w3"].transpose(1, 2, 0).reshape(C_last * L, latent_dim)
    rec = lat @ wdec.T + params["fc_dec_b2"].reshape(1, -1)
    h = rec.reshape(enc.shape)
    for i in range(n):
        h = block(h, params["blocks"][n + i], cfg[n + i])
    return h


if __name__ == "__main__":
    B = 2
    seq_len = 16
    input_dim = 1
    num_channels = [8, 16]
    kernel_size = 3
    latent_dim = 16

    key = jax.random.PRNGKey(0)
    kx, kp = jax.random.split(key)
    x = jax.random.normal(kx, (B, seq_len), jnp.float32)
    params = init_tcnae_params(kp, seq_len, input_dim, num_channels,
                               kernel_size, latent_dim)

    out = tcnae_forward(params, x)
    jax.block_until_ready(out)
    assert out.shape == (B, input_dim, seq_len), out.shape
    assert bool(jnp.all(jnp.isfinite(out)))

    ref = _tcnae_reference(params, x)
    max_err = float(jnp.max(jnp.abs(out - ref)))
    assert max_err < 5e-2, f"mismatch vs pure-JAX reference: max|diff|={max_err}"

    print("KERNEL_OK")
</pallas_src>

<mosaic_0001>
module attributes {stable_mosaic.version = 11 : i64} {
  func.func @_fused_tcnae_kernel(%arg0: memref<1x32xf32, #tpu.memory_space<vmem>>, %arg1: memref<8x3xf32, #tpu.memory_space<vmem>>, %arg2: memref<8x1xf32, #tpu.memory_space<vmem>>, %arg3: memref<8x1xf32, #tpu.memory_space<vmem>>, %arg4: memref<8x1xf32, #tpu.memory_space<vmem>>, %arg5: memref<16x24xf32, #tpu.memory_space<vmem>>, %arg6: memref<16x1xf32, #tpu.memory_space<vmem>>, %arg7: memref<16x1xf32, #tpu.memory_space<vmem>>, %arg8: memref<16x1xf32, #tpu.memory_space<vmem>>, %arg9: memref<8x48xf32, #tpu.memory_space<vmem>>, %arg10: memref<8x1xf32, #tpu.memory_space<vmem>>, %arg11: memref<8x1xf32, #tpu.memory_space<vmem>>, %arg12: memref<8x1xf32, #tpu.memory_space<vmem>>, %arg13: memref<1x24xf32, #tpu.memory_space<vmem>>, %arg14: memref<1x1xf32, #tpu.memory_space<vmem>>, %arg15: memref<1x1xf32, #tpu.memory_space<vmem>>, %arg16: memref<1x1xf32, #tpu.memory_space<vmem>>, %arg17: memref<16x16x16xf32, #tpu.memory_space<vmem>>, %arg18: memref<16x1xf32, #tpu.memory_space<vmem>>, %arg19: memref<16x16x16xf32, #tpu.memory_space<vmem>>, %arg20: memref<16x16xf32, #tpu.memory_space<vmem>>, %arg21: memref<2x1x16xf32, #tpu.memory_space<vmem>>, %arg22: memref<3x32xf32, #tpu.memory_space<vmem>>, %arg23: memref<24x32xf32, #tpu.memory_space<vmem>>, %arg24: memref<48x32xf32, #tpu.memory_space<vmem>>, %arg25: memref<24x32xf32, #tpu.memory_space<vmem>>, %arg26: memref<16x32xf32, #tpu.memory_space<vmem>>) attributes {dimension_semantics = [], scalar_prefetch = 0 : i64, scratch_operands = 5 : i64, tpu.core_type = #tpu.core_type<tc>} {
    %c0 = arith.constant 0 : index
    %c0_0 = arith.constant 0 : index
    %0 = vector.load %arg0[%c0, %c0_0] : memref<1x32xf32, #tpu.memory_space<vmem>>, vector<1x32xf32>
    %cst = arith.constant 0.000000e+00 : f32
    %1 = vector.broadcast %cst : f32 to vector<3x32xf32>
    %c0_1 = arith.constant 0 : index
    %c0_2 = arith.constant 0 : index
    %2 = vector.load %arg22[%c0_1, %c0_2] : memref<3x32xf32, #tpu.memory_space<vmem>>, vector<3x32xf32>
    tpu.vector_store %arg22[%c0_1, %c0_2], %1 {strides = array<i32>} : memref<3x32xf32, #tpu.memory_space<vmem>>, vector<3x32xf32>,
    %3 = vector.extract_strided_slice %0 {offsets = [0, 0], sizes = [1, 15], strides = [1, 1]} : vector<1x32xf32> to vector<1x15xf32>
    %c0_3 = arith.constant 0 : index
    %c1 = arith.constant 1 : index
    %4 = vector.load %arg22[%c0_3, %c1] : memref<3x32xf32, #tpu.memory_space<vmem>>, vector<1x15xf32>
    tpu.vector_store %arg22[%c0_3, %c1], %3 {strides = array<i32>} : memref<3x32xf32, #tpu.memory_space<vmem>>, vector<1x15xf32>,
    %5 = vector.extract_strided_slice %0 {offsets = [0, 16], sizes = [1, 15], strides = [1, 1]} : vector<1x32xf32> to vector<1x15xf32>
    %c0_4 = arith.constant 0 : index
    %c17 = arith.constant 17 : index
    %6 = vector.load %arg22[%c0_4, %c17] : memref<3x32xf32, #tpu.memory_space<vmem>>, vector<1x15xf32>
    tpu.vector_store %arg22[%c0_4, %c17], %5 {strides = array<i32>} : memref<3x32xf32, #tpu.memory_space<vmem>>, vector<1x15xf32>,
    %7 = vector.extract_strided_slice %0 {offsets = [0, 0], sizes = [1, 16], strides = [1, 1]} : vector<1x32xf32> to vector<1x16xf32>
    %c1_5 = arith.constant 1 : index
    %c0_6 = arith.constant 0 : index
    %8 = vector.load %arg22[%c1_5, %c0_6] : memref<3x32xf32, #tpu.memory_space<vmem>>, vector<1x16xf32>
    tpu.vector_store %arg22[%c1_5, %c0_6], %7 {strides = array<i32>} : memref<3x32xf32, #tpu.memory_space<vmem>>, vector<1x16xf32>,
    %9 = vector.extract_strided_slice %0 {offsets = [0, 16], sizes = [1, 16], strides = [1, 1]} : vector<1x32xf32> to vector<1x16xf32>
    %c1_7 = arith.constant 1 : index
    %c16 = arith.constant 16 : index
    %10 = vector.load %arg22[%c1_7, %c16] : memref<3x32xf32, #tpu.memory_space<vmem>>, vector<1x16xf32>
    tpu.vector_store %arg22[%c1_7, %c16], %9 {strides = array<i32>} : memref<3x32xf32, #tpu.memory_space<vmem>>, vector<1x16xf32>,
    %11 = vector.extract_strided_slice %0 {offsets = [0, 1], sizes = [1, 15], strides = [1, 1]} : vector<1x32xf32> to vector<1x15xf32>
    %c2 = arith.constant 2 : index
    %c0_8 = arith.constant 0 : index
    %12 = vector.load %arg22[%c2, %c0_8] : memref<3x32xf32, #tpu.memory_space<vmem>>, vector<1x15xf32>
    tpu.vector_store %arg22[%c2, %c0_8], %11 {strides = array<i32>} : memref<3x32xf32, #tpu.memory_space<vmem>>, vector<1x15xf32>,
    %13 = vector.extract_strided_slice %0 {offsets = [0, 17], sizes = [1, 15], strides = [1, 1]} : vector<1x32xf32> to vector<1x15xf32>
    %c2_9 = arith.constant 2 : index
    %c16_10 = arith.constant 16 : index
    %14 = vector.load %arg22[%c2_9, %c16_10] : memref<3x32xf32, #tpu.memory_space<vmem>>, vector<1x15xf32>
    tpu.vector_store %arg22[%c2_9, %c16_10], %13 {strides = array<i32>} : memref<3x32xf32, #tpu.memory_space<vmem>>, vector<1x15xf32>,
    %c0_11 = arith.constant 0 : index
    %c0_12 = arith.constant 0 : index
    %15 = vector.load %arg22[%c0_11, %c0_12] : memref<3x32xf32, #tpu.memory_space<vmem>>, vector<3x32xf32>
    %cst_13 = arith.constant 0.000000e+00 : f32
    %16 = vector.broadcast %cst_13 : f32 to vector<8x32xf32>
    %c0_14 = arith.constant 0 : index
    %c0_15 = arith.constant 0 : index
    %17 = vector.load %arg1[%c0_14, %c0_15] : memref<8x3xf32, #tpu.memory_space<vmem>>, vector<8x1xf32>
    %18 = vector.extract_strided_slice %15 {offsets = [0, 0], sizes = [1, 32], strides = [1, 1]} : vector<3x32xf32> to vector<1x32xf32>
    %19 = vector.broadcast %17 : vector<8x1xf32> to vector<8x32xf32>
    %20 = vector.broadcast %18 : vector<1x32xf32> to vector<8x32xf32>
    %21 = arith.mulf %19, %20 : vector<8x32xf32>
    %22 = arith.addf %16, %21 : vector<8x32xf32>
    %c0_16 = arith.constant 0 : index
    %c1_17 = arith.constant 1 : index
    %23 = vector.load %arg1[%c0_16, %c1_17] : memref<8x3xf32, #tpu.memory_space<vmem>>, vector<8x1xf32>
    %24 = vector.extract_strided_slice %15 {offsets = [1, 0], sizes = [1, 32], strides = [1, 1]} : vector<3x32xf32> to vector<1x32xf32>
    %25 = vector.broadcast %23 : vector<8x1xf32> to vector<8x32xf32>
    %26 = vector.broadcast %24 : vector<1x32xf32> to vector<8x32xf32>
    %27 = arith.mulf %25, %26 : vector<8x32xf32>
    %28 = arith.addf %22, %27 : vector<8x32xf32>
    %c0_18 = arith.constant 0 : index
    %c2_19 = arith.constant 2 : index
    %29 = vector.load %arg1[%c0_18, %c2_19] : memref<8x3xf32, #tpu.memory_space<vmem>>, vector<8x1xf32>
    %30 = vector.extract_strided_slice %15 {offsets = [2, 0], sizes = [1, 32], strides = [1, 1]} : vector<3x32xf32> to vector<1x32xf32>
    %31 = vector.broadcast %29 : vector<8x1xf32> to vector<8x32xf32>
    %32 = vector.broadcast %30 : vector<1x32xf32> to vector<8x32xf32>
    %33 = arith.mulf %31, %32 : vector<8x32xf32>
    %34 = arith.addf %28, %33 : vector<8x32xf32>
    %c0_20 = arith.constant 0 : index
    %c0_21 = arith.constant 0 : index
    %35 = vector.load %arg2[%c0_20, %c0_21] : memref<8x1xf32, #tpu.memory_space<vmem>>, vector<8x1xf32>
    %36 = vector.broadcast %35 : vector<8x1xf32> to vector<8x32xf32>
    %37 = arith.addf %34, %36 : vector<8x32xf32>
    %cst_22 = arith.constant dense<0.000000e+00> : vector<8xf32>
    %38 = vector.multi_reduction <add>, %37, %cst_22 [1] : vector<8x32xf32> to vector<8xf32>
    %39 = vector.shape_cast %38 : vector<8xf32> to vector<8x1xf32>
    %cst_23 = arith.constant 3.125000e-02 : f32
    %40 = vector.broadcast %cst_23 : f32 to vector<8x1xf32>
    %41 = arith.mulf %39, %40 : vector<8x1xf32>
    %42 = vector.broadcast %41 : vector<8x1xf32> to vector<8x32xf32>
    %43 = arith.subf %37, %42 : vector<8x32xf32>
    %44 = arith.mulf %43, %43 : vector<8x32xf32>
    %cst_24 = arith.constant dense<0.000000e+00> : vector<8xf32>
    %45 = vector.multi_reduction <add>, %44, %cst_24 [1] : vector<8x32xf32> to vector<8xf32>
    %46 = vector.shape_cast %45 : vector<8xf32> to vector<8x1xf32>
    %cst_25 = arith.constant 3.125000e-02 : f32
    %47 = vector.broadcast %cst_25 : f32 to vector<8x1xf32>
    %48 = arith.mulf %46, %47 : vector<8x1xf32>
    %cst_26 = arith.constant 9.99999974E-6 : f32
    %49 = vector.broadcast %cst_26 : f32 to vector<8x1xf32>
    %50 = arith.addf %48, %49 : vector<8x1xf32>
    %51 = math.rsqrt %50 : vector<8x1xf32>
    %c0_27 = arith.constant 0 : index
    %c0_28 = arith.constant 0 : index
    %52 = vector.load %arg3[%c0_27, %c0_28] : memref<8x1xf32, #tpu.memory_space<vmem>>, vector<8x1xf32>
    %53 = arith.mulf %51, %52 : vector<8x1xf32>
    %54 = vector.broadcast %53 : vector<8x1xf32> to vector<8x32xf32>
    %55 = arith.mulf %43, %54 : vector<8x32xf32>
    %c0_29 = arith.constant 0 : index
    %c0_30 = arith.constant 0 : index
    %56 = vector.load %arg4[%c0_29, %c0_30] : memref<8x1xf32, #tpu.memory_space<vmem>>, vector<8x1xf32>
    %57 = vector.broadcast %56 : vector<8x1xf32> to vector<8x32xf32>
    %58 = arith.addf %55, %57 : vector<8x32xf32>
    %cst_31 = arith.constant 0.000000e+00 : f32
    %59 = vector.broadcast %cst_31 : f32 to vector<8x32xf32>
    %60 = arith.maximumf %58, %59 : vector<8x32xf32>
    %cst_32 = arith.constant 0.000000e+00 : f32
    %61 = vector.broadcast %cst_32 : f32 to vector<24x32xf32>
    %c0_33 = arith.constant 0 : index
    %c0_34 = arith.constant 0 : index
    %62 = vector.load %arg23[%c0_33, %c0_34] : memref<24x32xf32, #tpu.memory_space<vmem>>, vector<24x32xf32>
    tpu.vector_store %arg23[%c0_33, %c0_34], %61 {strides = array<i32>} : memref<24x32xf32, #tpu.memory_space<vmem>>, vector<24x32xf32>,
    %63 = vector.extract_strided_slice %60 {offsets = [0, 0], sizes = [8, 14], strides = [1, 1]} : vector<8x32xf32> to vector<8x14xf32>
    %c0_35 = arith.constant 0 : index
    %c2_36 = arith.constant 2 : index
    %64 = vector.load %arg23[%c0_35, %c2_36] : memref<24x32xf32, #tpu.memory_space<vmem>>, vector<8x14xf32>
    tpu.vector_store %arg23[%c0_35, %c2_36], %63 {strides = array<i32>} : memref<24x32xf32, #tpu.memory_space<vmem>>, vector<8x14xf32>,
    %65 = vector.extract_strided_slice %60 {offsets = [0, 16], sizes = [8, 14], strides = [1, 1]} : vector<8x32xf32> to vector<8x14xf32>
    %c0_37 = arith.constant 0 : index
    %c18 = arith.constant 18 : index
    %66 = vector.load %arg23[%c0_37, %c18] : memref<24x32xf32, #tpu.memory_space<vmem>>, vector<8x14xf32>
    tpu.vector_store %arg23[%c0_37, %c18], %65 {strides = array<i32>} : memref<24x32xf32, #tpu.memory_space<vmem>>, vector<8x14xf32>,
    %67 = vector.extract_strided_slice %60 {offsets = [0, 0], sizes = [8, 16], strides = [1, 1]} : vector<8x32xf32> to vector<8x16xf32>
    %c8 = arith.constant 8 : index
    %c0_38 = arith.constant 0 : index
    %68 = vector.load %arg23[%c8, %c0_38] : memref<24x32xf32, #tpu.memory_space<vmem>>, vector<8x16xf32>
    tpu.vector_store %arg23[%c8, %c0_38], %67 {strides = array<i32>} : memref<24x32xf32, #tpu.memory_space<vmem>>, vector<8x16xf32>,
    %69 = vector.extract_strided_slice %60 {offsets = [0, 16], sizes = [8, 16], strides = [1, 1]} : vector<8x32xf32> to vector<8x16xf32>
    %c8_39 = arith.constant 8 : index
    %c16_40 = arith.constant 16 : index
    %70 = vector.load %arg23[%c8_39, %c16_40] : memref<24x32xf32, #tpu.memory_space<vmem>>, vector<8x16xf32>
    tpu.vector_store %arg23[%c8_39, %c16_40], %69 {strides = array<i32>} : memref<24x32xf32, #tpu.memory_space<vmem>>, vector<8x16xf32>,
    %71 = vector.extract_strided_slice %60 {offsets = [0, 2], sizes = [8, 14], strides = [1, 1]} : vector<8x32xf32> to vector<8x14xf32>
    %c16_41 = arith.constant 16 : index
    %c0_42 = arith.constant 0 : index
    %72 = vector.load %arg23[%c16_41, %c0_42] : memref<24x32xf32, #tpu.memory_space<vmem>>, vector<8x14xf32>
    tpu.vector_store %arg23[%c16_41, %c0_42], %71 {strides = array<i32>} : memref<24x32xf32, #tpu.memory_space<vmem>>, vector<8x14xf32>,
    %73 = vector.extract_strided_slice %60 {offsets = [0, 18], sizes = [8, 14], strides = [1, 1]} : vector<8x32xf32> to vector<8x14xf32>
    %c16_43 = arith.constant 16 : index
    %c16_44 = arith.constant 16 : index
    %74 = vector.load %arg23[%c16_43, %c16_44] : memref<24x32xf32, #tpu.memory_space<vmem>>, vector<8x14xf32>
    tpu.vector_store %arg23[%c16_43, %c16_44], %73 {strides = array<i32>} : memref<24x32xf32, #tpu.memory_space<vmem>>, vector<8x14xf32>,
    %c0_45 = arith.constant 0 : index
    %c0_46 = arith.constant 0 : index
    %75 = vector.load %arg23[%c0_45, %c0_46] : memref<24x32xf32, #tpu.memory_space<vmem>>, vector<24x32xf32>
    %c0_47 = arith.constant 0 : index
    %c0_48 = arith.constant 0 : index
    %76 = vector.load %arg5[%c0_47, %c0_48] : memref<16x24xf32, #tpu.memory_space<vmem>>, vector<16x24xf32>
    %cst_49 = arith.constant dense<0.000000e+00> : vector<16x32xf32>
    %77 = tpu.matmul %76, %75, %cst_49 {dimension_numbers = #tpu.dot_dimension_numbers<[1], [0], [0], [1], [0, 0, 1, 1], [], []>} : vector<16x24xf32>, vector<24x32xf32>, vector<16x32xf32> -> vector<16x32xf32>
    %c0_50 = arith.constant 0 : index
    %c0_51 = arith.constant 0 : index
    %78 = vector.load %arg6[%c0_50, %c0_51] : memref<16x1xf32, #tpu.memory_space<vmem>>, vector<16x1xf32>
    %79 = vector.broadcast %78 : vector<16x1xf32> to vector<16x32xf32>
    %80 = arith.addf %77, %79 : vector<16x32xf32>
    %cst_52 = arith.constant dense<0.000000e+00> : vector<16xf32>
    %81 = vector.multi_reduction <add>, %80, %cst_52 [1] : vector<16x32xf32> to vector<16xf32>
    %82 = vector.shape_cast %81 : vector<16xf32> to vector<16x1xf32>
    %cst_53 = arith.constant 3.125000e-02 : f32
    %83 = vector.broadcast %cst_53 : f32 to vector<16x1xf32>
    %84 = arith.mulf %82, %83 : vector<16x1xf32>
    %85 = vector.broadcast %84 : vector<16x1xf32> to vector<16x32xf32>
    %86 = arith.subf %80, %85 : vector<16x32xf32>
    %87 = arith.mulf %86, %86 : vector<16x32xf32>
    %cst_54 = arith.constant dense<0.000000e+00> : vector<16xf32>
    %88 = vector.multi_reduction <add>, %87, %cst_54 [1] : vector<16x32xf32> to vector<16xf32>
    %89 = vector.shape_cast %88 : vector<16xf32> to vector<16x1xf32>
    %cst_55 = arith.constant 3.125000e-02 : f32
    %90 = vector.broadcast %cst_55 : f32 to vector<16x1xf32>
    %91 = arith.mulf %89, %90 : vector<16x1xf32>
    %cst_56 = arith.constant 9.99999974E-6 : f32
    %92 = vector.broadcast %cst_56 : f32 to vector<16x1xf32>
    %93 = arith.addf %91, %92 : vector<16x1xf32>
    %94 = math.rsqrt %93 : vector<16x1xf32>
    %c0_57 = arith.constant 0 : index
    %c0_58 = arith.constant 0 : index
    %95 = vector.load %arg7[%c0_57, %c0_58] : memref<16x1xf32, #tpu.memory_space<vmem>>, vector<16x1xf32>
    %96 = arith.mulf %94, %95 : vector<16x1xf32>
    %97 = vector.broadcast %96 : vector<16x1xf32> to vector<16x32xf32>
    %98 = arith.mulf %86, %97 : vector<16x32xf32>
    %c0_59 = arith.constant 0 : index
    %c0_60 = arith.constant 0 : index
    %99 = vector.load %arg8[%c0_59, %c0_60] : memref<16x1xf32, #tpu.memory_space<vmem>>, vector<16x1xf32>
    %100 = vector.broadcast %99 : vector<16x1xf32> to vector<16x32xf32>
    %101 = arith.addf %98, %100 : vector<16x32xf32>
    %cst_61 = arith.constant 0.000000e+00 : f32
    %102 = vector.broadcast %cst_61 : f32 to vector<16x32xf32>
    %103 = arith.maximumf %101, %102 : vector<16x32xf32>
    %cst_62 = arith.constant 0.000000e+00 : f32
    %104 = vector.broadcast %cst_62 : f32 to vector<16x16xf32>
    %c0_63 = arith.constant 0 : index
    %c0_64 = arith.constant 0 : index
    %c0_65 = arith.constant 0 : index
    %105 = vector.load %arg17[%c0_63, %c0_64, %c0_65] : memref<16x16x16xf32, #tpu.memory_space<vmem>>, vector<1x16x16xf32>
    %106 = vector.shape_cast %105 : vector<1x16x16xf32> to vector<16x16xf32>
    %107 = vector.extract_strided_slice %103 {offsets = [0, 0], sizes = [1, 16], strides = [1, 1]} : vector<16x32xf32> to vector<1x16xf32>
    %108 = vector.broadcast %107 : vector<1x16xf32> to vector<16x16xf32>
    %109 = arith.mulf %106, %108 : vector<16x16xf32>
    %110 = arith.addf %104, %109 : vector<16x16xf32>
    %c1_66 = arith.constant 1 : index
    %c0_67 = arith.constant 0 : index
    %c0_68 = arith.constant 0 : index
    %111 = vector.load %arg17[%c1_66, %c0_67, %c0_68] : memref<16x16x16xf32, #tpu.memory_space<vmem>>, vector<1x16x16xf32>
    %112 = vector.shape_cast %111 : vector<1x16x16xf32> to vector<16x16xf32>
    %113 = vector.extract_strided_slice %103 {offsets = [1, 0], sizes = [1, 16], strides = [1, 1]} : vector<16x32xf32> to vector<1x16xf32>
    %114 = vector.broadcast %113 : vector<1x16xf32> to vector<16x16xf32>
    %115 = arith.mulf %112, %114 : vector<16x16xf32>
    %116 = arith.addf %110, %115 : vector<16x16xf32>
    %c2_69 = arith.constant 2 : index
    %c0_70 = arith.constant 0 : index
    %c0_71 = arith.constant 0 : index
    %117 = vector.load %arg17[%c2_69, %c0_70, %c0_71] : memref<16x16x16xf32, #tpu.memory_space<vmem>>, vector<1x16x16xf32>
    %118 = vector.shape_cast %117 : vector<1x16x16xf32> to vector<16x16xf32>
    %119 = vector.extract_strided_slice %103 {offsets = [2, 0], sizes = [1, 16], strides = [1, 1]} : vector<16x32xf32> to vector<1x16xf32>
    %120 = vector.broadcast %119 : vector<1x16xf32> to vector<16x16xf32>
    %121 = arith.mulf %118, %120 : vector<16x16xf32>
    %122 = arith.addf %116, %121 : vector<16x16xf32>
    %c3 = arith.constant 3 : index
    %c0_72 = arith.constant 0 : index
    %c0_73 = arith.constant 0 : index
    %123 = vector.load %arg17[%c3, %c0_72, %c0_73] : memref<16x16x16xf32, #tpu.memory_space<vmem>>, vector<1x16x16xf32>
    %124 = vector.shape_cast %123 : vector<1x16x16xf32> to vector<16x16xf32>
    %125 = vector.extract_strided_slice %103 {offsets = [3, 0], sizes = [1, 16], strides = [1, 1]} : vector<16x32xf32> to vector<1x16xf32>
    %126 = vector.broadcast %125 : vector<1x16xf32> to vector<16x16xf32>
    %127 = arith.mulf %124, %126 : vector<16x16xf32>
    %128 = arith.addf %122, %127 : vector<16x16xf32>
    %c4 = arith.constant 4 : index
    %c0_74 = arith.constant 0 : index
    %c0_75 = arith.constant 0 : index
    %129 = vector.load %arg17[%c4, %c0_74, %c0_75] : memref<16x16x16xf32, #tpu.memory_space<vmem>>, vector<1x16x16xf32>
    %130 = vector.shape_cast %129 : vector<1x16x16xf32> to vector<16x16xf32>
    %131 = vector.extract_strided_slice %103 {offsets = [4, 0], sizes = [1, 16], strides = [1, 1]} : vector<16x32xf32> to vector<1x16xf32>
    %132 = vector.broadcast %131 : vector<1x16xf32> to vector<16x16xf32>
    %133 = arith.mulf %130, %132 : vector<16x16xf32>
    %134 = arith.addf %128, %133 : vector<16x16xf32>
    %c5 = arith.constant 5 : index
    %c0_76 = arith.constant 0 : index
    %c0_77 = arith.constant 0 : index
    %135 = vector.load %arg17[%c5, %c0_76, %c0_77] : memref<16x16x16xf32, #tpu.memory_space<vmem>>, vector<1x16x16xf32>
    %136 = vector.shape_cast %135 : vector<1x16x16xf32> to vector<16x16xf32>
    %137 = vector.extract_strided_slice %103 {offsets = [5, 0], sizes = [1, 16], strides = [1, 1]} : vector<16x32xf32> to vector<1x16xf32>
    %138 = vector.broadcast %137 : vector<1x16xf32> to vector<16x16xf32>
    %139 = arith.mulf %136, %138 : vector<16x16xf32>
    %140 = arith.addf %134, %139 : vector<16x16xf32>
    %c6 = arith.constant 6 : index
    %c0_78 = arith.constant 0 : index
    %c0_79 = arith.constant 0 : index
    %141 = vector.load %arg17[%c6, %c0_78, %c0_79] : memref<16x16x16xf32, #tpu.memory_space<vmem>>, vector<1x16x16xf32>
    %142 = vector.shape_cast %141 : vector<1x16x16xf32> to vector<16x16xf32>
    %143 = vector.extract_strided_slice %103 {offsets = [6, 0], sizes = [1, 16], strides = [1, 1]} : vector<16x32xf32> to vector<1x16xf32>
    %144 = vector.broadcast %143 : vector<1x16xf32> to vector<16x16xf32>
    %145 = arith.mulf %142, %144 : vector<16x16xf32>
    %146 = arith.addf %140, %145 : vector<16x16xf32>
    %c7 = arith.constant 7 : index
    %c0_80 = arith.constant 0 : index
    %c0_81 = arith.constant 0 : index
    %147 = vector.load %arg17[%c7, %c0_80, %c0_81] : memref<16x16x16xf32, #tpu.memory_space<vmem>>, vector<1x16x16xf32>
    %148 = vector.shape_cast %147 : vector<1x16x16xf32> to vector<16x16xf32>
    %149 = vector.extract_strided_slice %103 {offsets = [7, 0], sizes = [1, 16], strides = [1, 1]} : vector<16x32xf32> to vector<1x16xf32>
    %150 = vector.broadcast %149 : vector<1x16xf32> to vector<16x16xf32>
    %151 = arith.mulf %148, %150 : vector<16x16xf32>
    %152 = arith.addf %146, %151 : vector<16x16xf32>
    %c8_82 = arith.constant 8 : index
    %c0_83 = arith.constant 0 : index
    %c0_84 = arith.constant 0 : index
    %153 = vector.load %arg17[%c8_82, %c0_83, %c0_84] : memref<16x16x16xf32, #tpu.memory_space<vmem>>, vector<1x16x16xf32>
    %154 = vector.shape_cast %153 : vector<1x16x16xf32> to vector<16x16xf32>
    %155 = vector.extract_strided_slice %103 {offsets = [8, 0], sizes = [1, 16], strides = [1, 1]} : vector<16x32xf32> to vector<1x16xf32>
    %156 = vector.broadcast %155 : vector<1x16xf32> to vector<16x16xf32>
    %157 = arith.mulf %154, %156 : vector<16x16xf32>
    %158 = arith.addf %152, %157 : vector<16x16xf32>
    %c9 = arith.constant 9 : index
    %c0_85 = arith.constant 0 : index
    %c0_86 = arith.constant 0 : index
    %159 = vector.load %arg17[%c9, %c0_85, %c0_86] : memref<16x16x16xf32, #tpu.memory_space<vmem>>, vector<1x16x16xf32>
    %160 = vector.shape_cast %159 : vector<1x16x16xf32> to vector<16x16xf32>
    %161 = vector.extract_strided_slice %103 {offsets = [9, 0], sizes = [1, 16], strides = [1, 1]} : vector<16x32xf32> to vector<1x16xf32>
    %162 = vector.broadcast %161 : vector<1x16xf32> to vector<16x16xf32>
    %163 = arith.mulf %160, %162 : vector<16x16xf32>
    %164 = arith.addf %158, %163 : vector<16x16xf32>
    %c10 = arith.constant 10 : index
    %c0_87 = arith.constant 0 : index
    %c0_88 = arith.constant 0 : index
    %165 = vector.load %arg17[%c10, %c0_87, %c0_88] : memref<16x16x16xf32, #tpu.memory_space<vmem>>, vector<1x16x16xf32>
    %166 = vector.shape_cast %165 : vector<1x16x16xf32> to vector<16x16xf32>
    %167 = vector.extract_strided_slice %103 {offsets = [10, 0], sizes = [1, 16], strides = [1, 1]} : vector<16x32xf32> to vector<1x16xf32>
    %168 = vector.broadcast %167 : vector<1x16xf32> to vector<16x16xf32>
    %169 = arith.mulf %166, %168 : vector<16x16xf32>
    %170 = arith.addf %164, %169 : vector<16x16xf32>
    %c11 = arith.constant 11 : index
    %c0_89 = arith.constant 0 : index
    %c0_90 = arith.constant 0 : index
    %171 = vector.load %arg17[%c11, %c0_89, %c0_90] : memref<16x16x16xf32, #tpu.memory_space<vmem>>, vector<1x16x16xf32>
    %172 = vector.shape_cast %171 : vector<1x16x16xf32> to vector<16x16xf32>
    %173 = vector.extract_strided_slice %103 {offsets = [11, 0], sizes = [1, 16], strides = [1, 1]} : vector<16x32xf32> to vector<1x16xf32>
    %174 = vector.broadcast %173 : vector<1x16xf32> to vector<16x16xf32>
    %175 = arith.mulf %172, %174 : vector<16x16xf32>
    %176 = arith.addf %170, %175 : vector<16x16xf32>
    %c12 = arith.constant 12 : index
    %c0_91 = arith.constant 0 : index
    %c0_92 = arith.constant 0 : index
    %177 = vector.load %arg17[%c12, %c0_91, %c0_92] : memref<16x16x16xf32, #tpu.memory_space<vmem>>, vector<1x16x16xf32>
    %178 = vector.shape_cast %177 : vector<1x16x16xf32> to vector<16x16xf32>
    %179 = vector.extract_strided_slice %103 {offsets = [12, 0], sizes = [1, 16], strides = [1, 1]} : vector<16x32xf32> to vector<1x16xf32>
    %180 = vector.broadcast %179 : vector<1x16xf32> to vector<16x16xf32>
    %181 = arith.mulf %178, %180 : vector<16x16xf32>
    %182 = arith.addf %176, %181 : vector<16x16xf32>
    %c13 = arith.constant 13 : index
    %c0_93 = arith.constant 0 : index
    %c0_94 = arith.constant 0 : index
    %183 = vector.load %arg17[%c13, %c0_93, %c0_94] : memref<16x16x16xf32, #tpu.memory_space<vmem>>, vector<1x16x16xf32>
    %184 = vector.shape_cast %183 : vector<1x16x16xf32> to vector<16x16xf32>
    %185 = vector.extract_strided_slice %103 {offsets = [13, 0], sizes = [1, 16], strides = [1, 1]} : vector<16x32xf32> to vector<1x16xf32>
    %186 = vector.broadcast %185 : vector<1x16xf32> to vector<16x16xf32>
    %187 = arith.mulf %184, %186 : vector<16x16xf32>
    %188 = arith.addf %182, %187 : vector<16x16xf32>
    %c14 = arith.constant 14 : index
    %c0_95 = arith.constant 0 : index
    %c0_96 = arith.constant 0 : index
    %189 = vector.load %arg17[%c14, %c0_95, %c0_96] : memref<16x16x16xf32, #tpu.memory_space<vmem>>, vector<1x16x16xf32>
    %190 = vector.shape_cast %189 : vector<1x16x16xf32> to vector<16x16xf32>
    %191 = vector.extract_strided_slice %103 {offsets = [14, 0], sizes = [1, 16], strides = [1, 1]} : vector<16x32xf32> to vector<1x16xf32>
    %192 = vector.broadcast %191 : vector<1x16xf32> to vector<16x16xf32>
    %193 = arith.mulf %190, %192 : vector<16x16xf32>
    %194 = arith.addf %188, %193 : vector<16x16xf32>
    %c15 = arith.constant 15 : index
    %c0_97 = arith.constant 0 : index
    %c0_98 = arith.constant 0 : index
    %195 = vector.load %arg17[%c15, %c0_97, %c0_98] : memref<16x16x16xf32, #tpu.memory_space<vmem>>, vector<1x16x16xf32>
    %196 = vector.shape_cast %195 : vector<1x16x16xf32> to vector<16x16xf32>
    %197 = vector.extract_strided_slice %103 {offsets = [15, 0], sizes = [1, 16], strides = [1, 1]} : vector<16x32xf32> to vector<1x16xf32>
    %198 = vector.broadcast %197 : vector<1x16xf32> to vector<16x16xf32>
    %199 = arith.mulf %196, %198 : vector<16x16xf32>
    %200 = arith.addf %194, %199 : vector<16x16xf32>
    %cst_99 = arith.constant dense<0.000000e+00> : vector<16xf32>
    %201 = vector.multi_reduction <add>, %200, %cst_99 [1] : vector<16x16xf32> to vector<16xf32>
    %202 = vector.shape_cast %201 : vector<16xf32> to vector<16x1xf32>
    %c0_100 = arith.constant 0 : index
    %c0_101 = arith.constant 0 : index
    %203 = vector.load %arg18[%c0_100, %c0_101] : memref<16x1xf32, #tpu.memory_space<vmem>>, vector<16x1xf32>
    %204 = arith.addf %202, %203 : vector<16x1xf32>
    %c0_102 = arith.constant 0 : index
    %c0_103 = arith.constant 0 : index
    %205 = vector.load %arg20[%c0_102, %c0_103] : memref<16x16xf32, #tpu.memory_space<vmem>>, vector<16x16xf32>
    %c0_104 = arith.constant 0 : index
    %c0_105 = arith.constant 0 : index
    %c0_106 = arith.constant 0 : index
    %206 = vector.load %arg19[%c0_104, %c0_105, %c0_106] : memref<16x16x16xf32, #tpu.memory_space<vmem>>, vector<1x16x16xf32>
    %207 = vector.shape_cast %206 : vector<1x16x16xf32> to vector<16x16xf32>
    %208 = vector.extract_strided_slice %204 {offsets = [0, 0], sizes = [1, 1], strides = [1, 1]} : vector<16x1xf32> to vector<1x1xf32>
    %209 = vector.broadcast %208 : vector<1x1xf32> to vector<16x16xf32>
    %210 = arith.mulf %207, %209 : vector<16x16xf32>
    %211 = arith.addf %205, %210 : vector<16x16xf32>
    %c1_107 = arith.constant 1 : index
    %c0_108 = arith.constant 0 : index
    %c0_109 = arith.constant 0 : index
    %212 = vector.load %arg19[%c1_107, %c0_108, %c0_109] : memref<16x16x16xf32, #tpu.memory_space<vmem>>, vector<1x16x16xf32>
    %213 = vector.shape_cast %212 : vector<1x16x16xf32> to vector<16x16xf32>
    %214 = vector.extract_strided_slice %204 {offsets = [1, 0], sizes = [1, 1], strides = [1, 1]} : vector<16x1xf32> to vector<1x1xf32>
    %215 = vector.broadcast %214 : vector<1x1xf32> to vector<16x16xf32>
    %216 = arith.mulf %213, %215 : vector<16x16xf32>
    %217 = arith.addf %211, %216 : vector<16x16xf32>
    %c2_110 = arith.constant 2 : index
    %c0_111 = arith.constant 0 : index
    %c0_112 = arith.constant 0 : index
    %218 = vector.load %arg19[%c2_110, %c0_111, %c0_112] : memref<16x16x16xf32, #tpu.memory_space<vmem>>, vector<1x16x16xf32>
    %219 = vector.shape_cast %218 : vector<1x16x16xf32> to vector<16x16xf32>
    %220 = vector.extract_strided_slice %204 {offsets = [2, 0], sizes = [1, 1], strides = [1, 1]} : vector<16x1xf32> to vector<1x1xf32>
    %221 = vector.broadcast %220 : vector<1x1xf32> to vector<16x16xf32>
    %222 = arith.mulf %219, %221 : vector<16x16xf32>
    %223 = arith.addf %217, %222 : vector<16x16xf32>
    %c3_113 = arith.constant 3 : index
    %c0_114 = arith.constant 0 : index
    %c0_115 = arith.constant 0 : index
    %224 = vector.load %arg19[%c3_113, %c0_114, %c0_115] : memref<16x16x16xf32, #tpu.memory_space<vmem>>, vector<1x16x16xf32>
    %225 = vector.shape_cast %224 : vector<1x16x16xf32> to vector<16x16xf32>
    %226 = vector.extract_strided_slice %204 {offsets = [3, 0], sizes = [1, 1], strides = [1, 1]} : vector<16x1xf32> to vector<1x1xf32>
    %227 = vector.broadcast %226 : vector<1x1xf32> to vector<16x16xf32>
    %228 = arith.mulf %225, %227 : vector<16x16xf32>
    %229 = arith.addf %223, %228 : vector<16x16xf32>
    %c4_116 = arith.constant 4 : index
    %c0_117 = arith.constant 0 : index
    %c0_118 = arith.constant 0 : index
    %230 = vector.load %arg19[%c4_116, %c0_117, %c0_118] : memref<16x16x16xf32, #tpu.memory_space<vmem>>, vector<1x16x16xf32>
    %231 = vector.shape_cast %230 : vector<1x16x16xf32> to vector<16x16xf32>
    %232 = vector.extract_strided_slice %204 {offsets = [4, 0], sizes = [1, 1], strides = [1, 1]} : vector<16x1xf32> to vector<1x1xf32>
    %233 = vector.broadcast %232 : vector<1x1xf32> to vector<16x16xf32>
    %234 = arith.mulf %231, %233 : vector<16x16xf32>
    %235 = arith.addf %229, %234 : vector<16x16xf32>
    %c5_119 = arith.constant 5 : index
    %c0_120 = arith.constant 0 : index
    %c0_121 = arith.constant 0 : index
    %236 = vector.load %arg19[%c5_119, %c0_120, %c0_121] : memref<16x16x16xf32, #tpu.memory_space<vmem>>, vector<1x16x16xf32>
    %237 = vector.shape_cast %236 : vector<1x16x16xf32> to vector<16x16xf32>
    %238 = vector.extract_strided_slice %204 {offsets = [5, 0], sizes = [1, 1], strides = [1, 1]} : vector<16x1xf32> to vector<1x1xf32>
    %239 = vector.broadcast %238 : vector<1x1xf32> to vector<16x16xf32>
    %240 = arith.mulf %237, %239 : vector<16x16xf32>
    %241 = arith.addf %235, %240 : vector<16x16xf32>
    %c6_122 = arith.constant 6 : index
    %c0_123 = arith.constant 0 : index
    %c0_124 = arith.constant 0 : index
    %242 = vector.load %arg19[%c6_122, %c0_123, %c0_124] : memref<16x16x16xf32, #tpu.memory_space<vmem>>, vector<1x16x16xf32>
    %243 = vector.shape_cast %242 : vector<1x16x16xf32> to vector<16x16xf32>
    %244 = vector.extract_strided_slice %204 {offsets = [6, 0], sizes = [1, 1], strides = [1, 1]} : vector<16x1xf32> to vector<1x1xf32>
    %245 = vector.broadcast %244 : vector<1x1xf32> to vector<16x16xf32>
    %246 = arith.mulf %243, %245 : vector<16x16xf32>
    %247 = arith.addf %241, %246 : vector<16x16xf32>
    %c7_125 = arith.constant 7 : index
    %c0_126 = arith.constant 0 : index
    %c0_127 = arith.constant 0 : index
    %248 = vector.load %arg19[%c7_125, %c0_126, %c0_127] : memref<16x16x16xf32, #tpu.memory_space<vmem>>, vector<1x16x16xf32>
    %249 = vector.shape_cast %248 : vector<1x16x16xf32> to vector<16x16xf32>
    %250 = vector.extract_strided_slice %204 {offsets = [7, 0], sizes = [1, 1], strides = [1, 1]} : vector<16x1xf32> to vector<1x1xf32>
    %251 = vector.broadcast %250 : vector<1x1xf32> to vector<16x16xf32>
    %252 = arith.mulf %249, %251 : vector<16x16xf32>
    %253 = arith.addf %247, %252 : vector<16x16xf32>
    %c8_128 = arith.constant 8 : index
    %c0_129 = arith.constant 0 : index
    %c0_130 = arith.constant 0 : index
    %254 = vector.load %arg19[%c8_128, %c0_129, %c0_130] : memref<16x16x16xf32, #tpu.memory_space<vmem>>, vector<1x16x16xf32>
    %255 = vector.shape_cast %254 : vector<1x16x16xf32> to vector<16x16xf32>
    %256 = vector.extract_strided_slice %204 {offsets = [8, 0], sizes = [1, 1], strides = [1, 1]} : vector<16x1xf32> to vector<1x1xf32>
    %257 = vector.broadcast %256 : vector<1x1xf32> to vector<16x16xf32>
    %258 = arith.mulf %255, %257 : vector<16x16xf32>
    %259 = arith.addf %253, %258 : vector<16x16xf32>
    %c9_131 = arith.constant 9 : index
    %c0_132 = arith.constant 0 : index
    %c0_133 = arith.constant 0 : index
    %260 = vector.load %arg19[%c9_131, %c0_132, %c0_133] : memref<16x16x16xf32, #tpu.memory_space<vmem>>, vector<1x16x16xf32>
    %261 = vector.shape_cast %260 : vector<1x16x16xf32> to vector<16x16xf32>
    %262 = vector.extract_strided_slice %204 {offsets = [9, 0], sizes = [1, 1], strides = [1, 1]} : vector<16x1xf32> to vector<1x1xf32>
    %263 = vector.broadcast %262 : vector<1x1xf32> to vector<16x16xf32>
    %264 = arith.mulf %261, %263 : vector<16x16xf32>
    %265 = arith.addf %259, %264 : vector<16x16xf32>
    %c10_134 = arith.constant 10 : index
    %c0_135 = arith.constant 0 : index
    %c0_136 = arith.constant 0 : index
    %266 = vector.load %arg19[%c10_134, %c0_135, %c0_136] : memref<16x16x16xf32, #tpu.memory_space<vmem>>, vector<1x16x16xf32>
    %267 = vector.shape_cast %266 : vector<1x16x16xf32> to vector<16x16xf32>
    %268 = vector.extract_strided_slice %204 {offsets = [10, 0], sizes = [1, 1], strides = [1, 1]} : vector<16x1xf32> to vector<1x1xf32>
    %269 = vector.broadcast %268 : vector<1x1xf32> to vector<16x16xf32>
    %270 = arith.mulf %267, %269 : vector<16x16xf32>
    %271 = arith.addf %265, %270 : vector<16x16xf32>
    %c11_137 = arith.constant 11 : index
    %c0_138 = arith.constant 0 : index
    %c0_139 = arith.constant 0 : index
    %272 = vector.load %arg19[%c11_137, %c0_138, %c0_139] : memref<16x16x16xf32, #tpu.memory_space<vmem>>, vector<1x16x16xf32>
    %273 = vector.shape_cast %272 : vector<1x16x16xf32> to vector<16x16xf32>
    %274 = vector.extract_strided_slice %204 {offsets = [11, 0], sizes = [1, 1], strides = [1, 1]} : vector<16x1xf32> to vector<1x1xf32>
    %275 = vector.broadcast %274 : vector<1x1xf32> to vector<16x16xf32>
    %276 = arith.mulf %273, %275 : vector<16x16xf32>
    %277 = arith.addf %271, %276 : vector<16x16xf32>
    %c12_140 = arith.constant 12 : index
    %c0_141 = arith.constant 0 : index
    %c0_142 = arith.constant 0 : index
    %278 = vector.load %arg19[%c12_140, %c0_141, %c0_142] : memref<16x16x16xf32, #tpu.memory_space<vmem>>, vector<1x16x16xf32>
    %279 = vector.shape_cast %278 : vector<1x16x16xf32> to vector<16x16xf32>
    %280 = vector.extract_strided_slice %204 {offsets = [12, 0], sizes = [1, 1], strides = [1, 1]} : vector<16x1xf32> to vector<1x1xf32>
    %281 = vector.broadcast %280 : vector<1x1xf32> to vector<16x16xf32>
    %282 = arith.mulf %279, %281 : vector<16x16xf32>
    %283 = arith.addf %277, %282 : vector<16x16xf32>
    %c13_143 = arith.constant 13 : index
    %c0_144 = arith.constant 0 : index
    %c0_145 = arith.constant 0 : index
    %284 = vector.load %arg19[%c13_143, %c0_144, %c0_145] : memref<16x16x16xf32, #tpu.memory_space<vmem>>, vector<1x16x16xf32>
    %285 = vector.shape_cast %284 : vector<1x16x16xf32> to vector<16x16xf32>
    %286 = vector.extract_strided_slice %204 {offsets = [13, 0], sizes = [1, 1], strides = [1, 1]} : vector<16x1xf32> to vector<1x1xf32>
    %287 = vector.broadcast %286 : vector<1x1xf32> to vector<16x16xf32>
    %288 = arith.mulf %285, %287 : vector<16x16xf32>
    %289 = arith.addf %283, %288 : vector<16x16xf32>
    %c14_146 = arith.constant 14 : index
    %c0_147 = arith.constant 0 : index
    %c0_148 = arith.constant 0 : index
    %290 = vector.load %arg19[%c14_146, %c0_147, %c0_148] : memref<16x16x16xf32, #tpu.memory_space<vmem>>, vector<1x16x16xf32>
    %291 = vector.shape_cast %290 : vector<1x16x16xf32> to vector<16x16xf32>
    %292 = vector.extract_strided_slice %204 {offsets = [14, 0], sizes = [1, 1], strides = [1, 1]} : vector<16x1xf32> to vector<1x1xf32>
    %293 = vector.broadcast %292 : vector<1x1xf32> to vector<16x16xf32>
    %294 = arith.mulf %291, %293 : vector<16x16xf32>
    %295 = arith.addf %289, %294 : vector<16x16xf32>
    %c15_149 = arith.constant 15 : index
    %c0_150 = arith.constant 0 : index
    %c0_151 = arith.constant 0 : index
    %296 = vector.load %arg19[%c15_149, %c0_150, %c0_151] : memref<16x16x16xf32, #tpu.memory_space<vmem>>, vector<1x16x16xf32>
    %297 = vector.shape_cast %296 : vector<1x16x16xf32> to vector<16x16xf32>
    %298 = vector.extract_strided_slice %204 {offsets = [15, 0], sizes = [1, 1], strides = [1, 1]} : vector<16x1xf32> to vector<1x1xf32>
    %299 = vector.broadcast %298 : vector<1x1xf32> to vector<16x16xf32>
    %300 = arith.mulf %297, %299 : vector<16x16xf32>
    %301 = arith.addf %295, %300 : vector<16x16xf32>
    %c0_152 = arith.constant 0 : index
    %c0_153 = arith.constant 0 : index
    %302 = vector.load %arg26[%c0_152, %c0_153] : memref<16x32xf32, #tpu.memory_space<vmem>>, vector<16x16xf32>
    tpu.vector_store %arg26[%c0_152, %c0_153], %301 {strides = array<i32>} : memref<16x32xf32, #tpu.memory_space<vmem>>, vector<16x16xf32>,
    %cst_154 = arith.constant 0.000000e+00 : f32
    %303 = vector.broadcast %cst_154 : f32 to vector<16x16xf32>
    %c0_155 = arith.constant 0 : index
    %c0_156 = arith.constant 0 : index
    %c0_157 = arith.constant 0 : index
    %304 = vector.load %arg17[%c0_155, %c0_156, %c0_157] : memref<16x16x16xf32, #tpu.memory_space<vmem>>, vector<1x16x16xf32>
    %305 = vector.shape_cast %304 : vector<1x16x16xf32> to vector<16x16xf32>
    %306 = vector.extract_strided_slice %103 {offsets = [0, 16], sizes = [1, 16], strides = [1, 1]} : vector<16x32xf32> to vector<1x16xf32>
    %307 = vector.broadcast %306 : vector<1x16xf32> to vector<16x16xf32>
    %308 = arith.mulf %305, %307 : vector<16x16xf32>
    %309 = arith.addf %303, %308 : vector<16x16xf32>
    %c1_158 = arith.constant 1 : index
    %c0_159 = arith.constant 0 : index
    %c0_160 = arith.constant 0 : index
    %310 = vector.load %arg17[%c1_158, %c0_159, %c0_160] : memref<16x16x16xf32, #tpu.memory_space<vmem>>, vector<1x16x16xf32>
    %311 = vector.shape_cast %310 : vector<1x16x16xf32> to vector<16x16xf32>
    %312 = vector.extract_strided_slice %103 {offsets = [1, 16], sizes = [1, 16], strides = [1, 1]} : vector<16x32xf32> to vector<1x16xf32>
    %313 = vector.broadcast %312 : vector<1x16xf32> to vector<16x16xf32>
    %314 = arith.mulf %311, %313 : vector<16x16xf32>
    %315 = arith.addf %309, %314 : vector<16x16xf32>
    %c2_161 = arith.constant 2 : index
    %c0_162 = arith.constant 0 : index
    %c0_163 = arith.constant 0 : index
    %316 = vector.load %arg17[%c2_161, %c0_162, %c0_163] : memref<16x16x16xf32, #tpu.memory_space<vmem>>, vector<1x16x16xf32>
    %317 = vector.shape_cast %316 : vector<1x16x16xf32> to vector<16x16xf32>
    %318 = vector.extract_strided_slice %103 {offsets = [2, 16], sizes = [1, 16], strides = [1, 1]} : vector<16x32xf32> to vector<1x16xf32>
    %319 = vector.broadcast %318 : vector<1x16xf32> to vector<16x16xf32>
    %320 = arith.mulf %317, %319 : vector<16x16xf32>
    %321 = arith.addf %315, %320 : vector<16x16xf32>
    %c3_164 = arith.constant 3 : index
    %c0_165 = arith.constant 0 : index
    %c0_166 = arith.constant 0 : index
    %322 = vector.load %arg17[%c3_164, %c0_165, %c0_166] : memref<16x16x16xf32, #tpu.memory_space<vmem>>, vector<1x16x16xf32>
    %323 = vector.shape_cast %322 : vector<1x16x16xf32> to vector<16x16xf32>
    %324 = vector.extract_strided_slice %103 {offsets = [3, 16], sizes = [1, 16], strides = [1, 1]} : vector<16x32xf32> to vector<1x16xf32>
    %325 = vector.broadcast %324 : vector<1x16xf32> to vector<16x16xf32>
    %326 = arith.mulf %323, %325 : vector<16x16xf32>
    %327 = arith.addf %321, %326 : vector<16x16xf32>
    %c4_167 = arith.constant 4 : index
    %c0_168 = arith.constant 0 : index
    %c0_169 = arith.constant 0 : index
    %328 = vector.load %arg17[%c4_167, %c0_168, %c0_169] : memref<16x16x16xf32, #tpu.memory_space<vmem>>, vector<1x16x16xf32>
    %329 = vector.shape_cast %328 : vector<1x16x16xf32> to vector<16x16xf32>
    %330 = vector.extract_strided_slice %103 {offsets = [4, 16], sizes = [1, 16], strides = [1, 1]} : vector<16x32xf32> to vector<1x16xf32>
    %331 = vector.broadcast %330 : vector<1x16xf32> to vector<16x16xf32>
    %332 = arith.mulf %329, %331 : vector<16x16xf32>
    %333 = arith.addf %327, %332 : vector<16x16xf32>
    %c5_170 = arith.constant 5 : index
    %c0_171 = arith.constant 0 : index
    %c0_172 = arith.constant 0 : index
    %334 = vector.load %arg17[%c5_170, %c0_171, %c0_172] : memref<16x16x16xf32, #tpu.memory_space<vmem>>, vector<1x16x16xf32>
    %335 = vector.shape_cast %334 : vector<1x16x16xf32> to vector<16x16xf32>
    %336 = vector.extract_strided_slice %103 {offsets = [5, 16], sizes = [1, 16], strides = [1, 1]} : vector<16x32xf32> to vector<1x16xf32>
    %337 = vector.broadcast %336 : vector<1x16xf32> to vector<16x16xf32>
    %338 = arith.mulf %335, %337 : vector<16x16xf32>
    %339 = arith.addf %333, %338 : vector<16x16xf32>
    %c6_173 = arith.constant 6 : index
    %c0_174 = arith.constant 0 : index
    %c0_175 = arith.constant 0 : index
    %340 = vector.load %arg17[%c6_173, %c0_174, %c0_175] : memref<16x16x16xf32, #tpu.memory_space<vmem>>, vector<1x16x16xf32>
    %341 = vector.shape_cast %340 : vector<1x16x16xf32> to vector<16x16xf32>
    %342 = vector.extract_strided_slice %103 {offsets = [6, 16], sizes = [1, 16], strides = [1, 1]} : vector<16x32xf32> to vector<1x16xf32>
    %343 = vector.broadcast %342 : vector<1x16xf32> to vector<16x16xf32>
    %344 = arith.mulf %341, %343 : vector<16x16xf32>
    %345 = arith.addf %339, %344 : vector<16x16xf32>
    %c7_176 = arith.constant 7 : index
    %c0_177 = arith.constant 0 : index
    %c0_178 = arith.constant 0 : index
    %346 = vector.load %arg17[%c7_176, %c0_177, %c0_178] : memref<16x16x16xf32, #tpu.memory_space<vmem>>, vector<1x16x16xf32>
    %347 = vector.shape_cast %346 : vector<1x16x16xf32> to vector<16x16xf32>
    %348 = vector.extract_strided_slice %103 {offsets = [7, 16], sizes = [1, 16], strides = [1, 1]} : vector<16x32xf32> to vector<1x16xf32>
    %349 = vector.broadcast %348 : vector<1x16xf32> to vector<16x16xf32>
    %350 = arith.mulf %347, %349 : vector<16x16xf32>
    %351 = arith.addf %345, %350 : vector<16x16xf32>
    %c8_179 = arith.constant 8 : index
    %c0_180 = arith.constant 0 : index
    %c0_181 = arith.constant 0 : index
    %352 = vector.load %arg17[%c8_179, %c0_180, %c0_181] : memref<16x16x16xf32, #tpu.memory_space<vmem>>, vector<1x16x16xf32>
    %353 = vector.shape_cast %352 : vector<1x16x16xf32> to vector<16x16xf32>
    %354 = vector.extract_strided_slice %103 {offsets = [8, 16], sizes = [1, 16], strides = [1, 1]} : vector<16x32xf32> to vector<1x16xf32>
    %355 = vector.broadcast %354 : vector<1x16xf32> to vector<16x16xf32>
    %356 = arith.mulf %353, %355 : vector<16x16xf32>
    %357 = arith.addf %351, %356 : vector<16x16xf32>
    %c9_182 = arith.constant 9 : index
    %c0_183 = arith.constant 0 : index
    %c0_184 = arith.constant 0 : index
    %358 = vector.load %arg17[%c9_182, %c0_183, %c0_184] : memref<16x16x16xf32, #tpu.memory_space<vmem>>, vector<1x16x16xf32>
    %359 = vector.shape_cast %358 : vector<1x16x16xf32> to vector<16x16xf32>
    %360 = vector.extract_strided_slice %103 {offsets = [9, 16], sizes = [1, 16], strides = [1, 1]} : vector<16x32xf32> to vector<1x16xf32>
    %361 = vector.broadcast %360 : vector<1x16xf32> to vector<16x16xf32>
    %362 = arith.mulf %359, %361 : vector<16x16xf32>
    %363 = arith.addf %357, %362 : vector<16x16xf32>
    %c10_185 = arith.constant 10 : index
    %c0_186 = arith.constant 0 : index
    %c0_187 = arith.constant 0 : index
    %364 = vector.load %arg17[%c10_185, %c0_186, %c0_187] : memref<16x16x16xf32, #tpu.memory_space<vmem>>, vector<1x16x16xf32>
    %365 = vector.shape_cast %364 : vector<1x16x16xf32> to vector<16x16xf32>
    %366 = vector.extract_strided_slice %103 {offsets = [10, 16], sizes = [1, 16], strides = [1, 1]} : vector<16x32xf32> to vector<1x16xf32>
    %367 = vector.broadcast %366 : vector<1x16xf32> to vector<16x16xf32>
    %368 = arith.mulf %365, %367 : vector<16x16xf32>
    %369 = arith.addf %363, %368 : vector<16x16xf32>
    %c11_188 = arith.constant 11 : index
    %c0_189 = arith.constant 0 : index
    %c0_190 = arith.constant 0 : index
    %370 = vector.load %arg17[%c11_188, %c0_189, %c0_190] : memref<16x16x16xf32, #tpu.memory_space<vmem>>, vector<1x16x16xf32>
    %371 = vector.shape_cast %370 : vector<1x16x16xf32> to vector<16x16xf32>
    %372 = vector.extract_strided_slice %103 {offsets = [11, 16], sizes = [1, 16], strides = [1, 1]} : vector<16x32xf32> to vector<1x16xf32>
    %373 = vector.broadcast %372 : vector<1x16xf32> to vector<16x16xf32>
    %374 = arith.mulf %371, %373 : vector<16x16xf32>
    %375 = arith.addf %369, %374 : vector<16x16xf32>
    %c12_191 = arith.constant 12 : index
    %c0_192 = arith.constant 0 : index
    %c0_193 = arith.constant 0 : index
    %376 = vector.load %arg17[%c12_191, %c0_192, %c0_193] : memref<16x16x16xf32, #tpu.memory_space<vmem>>, vector<1x16x16xf32>
    %377 = vector.shape_cast %376 : vector<1x16x16xf32> to vector<16x16xf32>
    %378 = vector.extract_strided_slice %103 {offsets = [12, 16], sizes = [1, 16], strides = [1, 1]} : vector<16x32xf32> to vector<1x16xf32>
    %379 = vector.broadcast %378 : vector<1x16xf32> to vector<16x16xf32>
    %380 = arith.mulf %377, %379 : vector<16x16xf32>
    %381 = arith.addf %375, %380 : vector<16x16xf32>
    %c13_194 = arith.constant 13 : index
    %c0_195 = arith.constant 0 : index
    %c0_196 = arith.constant 0 : index
    %382 = vector.load %arg17[%c13_194, %c0_195, %c0_196] : memref<16x16x16xf32, #tpu.memory_space<vmem>>, vector<1x16x16xf32>
    %383 = vector.shape_cast %382 : vector<1x16x16xf32> to vector<16x16xf32>
    %384 = vector.extract_strided_slice %103 {offsets = [13, 16], sizes = [1, 16], strides = [1, 1]} : vector<16x32xf32> to vector<1x16xf32>
    %385 = vector.broadcast %384 : vector<1x16xf32> to vector<16x16xf32>
    %386 = arith.mulf %383, %385 : vector<16x16xf32>
    %387 = arith.addf %381, %386 : vector<16x16xf32>
    %c14_197 = arith.constant 14 : index
    %c0_198 = arith.constant 0 : index
    %c0_199 = arith.constant 0 : index
    %388 = vector.load %arg17[%c14_197, %c0_198, %c0_199] : memref<16x16x16xf32, #tpu.memory_space<vmem>>, vector<1x16x16xf32>
    %389 = vector.shape_cast %388 : vector<1x16x16xf32> to vector<16x16xf32>
    %390 = vector.extract_strided_slice %103 {offsets = [14, 16], sizes = [1, 16], strides = [1, 1]} : vector<16x32xf32> to vector<1x16xf32>
    %391 = vector.broadcast %390 : vector<1x16xf32> to vector<16x16xf32>
    %392 = arith.mulf %389, %391 : vector<16x16xf32>
    %393 = arith.addf %387, %392 : vector<16x16xf32>
    %c15_200 = arith.constant 15 : index
    %c0_201 = arith.constant 0 : index
    %c0_202 = arith.constant 0 : index
    %394 = vector.load %arg17[%c15_200, %c0_201, %c0_202] : memref<16x16x16xf32, #tpu.memory_space<vmem>>, vector<1x16x16xf32>
    %395 = vector.shape_cast %394 : vector<1x16x16xf32> to vector<16x16xf32>
    %396 = vector.extract_strided_slice %103 {offsets = [15, 16], sizes = [1, 16], strides = [1, 1]} : vector<16x32xf32> to vector<1x16xf32>
    %397 = vector.broadcast %396 : vector<1x16xf32> to vector<16x16xf32>
    %398 = arith.mulf %395, %397 : vector<16x16xf32>
    %399 = arith.addf %393, %398 : vector<16x16xf32>
    %cst_203 = arith.constant dense<0.000000e+00> : vector<16xf32>
    %400 = vector.multi_reduction <add>, %399, %cst_203 [1] : vector<16x16xf32> to vector<16xf32>
    %401 = vector.shape_cast %400 : vector<16xf32> to vector<16x1xf32>
    %c0_204 = arith.constant 0 : index
    %c0_205 = arith.constant 0 : index
    %402 = vector.load %arg18[%c0_204, %c0_205] : memref<16x1xf32, #tpu.memory_space<vmem>>, vector<16x1xf32>
    %403 = arith.addf %401, %402 : vector<16x1xf32>
    %c0_206 = arith.constant 0 : index
    %c0_207 = arith.constant 0 : index
    %404 = vector.load %arg20[%c0_206, %c0_207] : memref<16x16xf32, #tpu.memory_space<vmem>>, vector<16x16xf32>
    %c0_208 = arith.constant 0 : index
    %c0_209 = arith.constant 0 : index
    %c0_210 = arith.constant 0 : index
    %405 = vector.load %arg19[%c0_208, %c0_209, %c0_210] : memref<16x16x16xf32, #tpu.memory_space<vmem>>, vector<1x16x16xf32>
    %406 = vector.shape_cast %405 : vector<1x16x16xf32> to vector<16x16xf32>
    %407 = vector.extract_strided_slice %403 {offsets = [0, 0], sizes = [1, 1], strides = [1, 1]} : vector<16x1xf32> to vector<1x1xf32>
    %408 = vector.broadcast %407 : vector<1x1xf32> to vector<16x16xf32>
    %409 = arith.mulf %406, %408 : vector<16x16xf32>
    %410 = arith.addf %404, %409 : vector<16x16xf32>
    %c1_211 = arith.constant 1 : index
    %c0_212 = arith.constant 0 : index
    %c0_213 = arith.constant 0 : index
    %411 = vector.load %arg19[%c1_211, %c0_212, %c0_213] : memref<16x16x16xf32, #tpu.memory_space<vmem>>, vector<1x16x16xf32>
    %412 = vector.shape_cast %411 : vector<1x16x16xf32> to vector<16x16xf32>
    %413 = vector.extract_strided_slice %403 {offsets = [1, 0], sizes = [1, 1], strides = [1, 1]} : vector<16x1xf32> to vector<1x1xf32>
    %414 = vector.broadcast %413 : vector<1x1xf32> to vector<16x16xf32>
    %415 = arith.mulf %412, %414 : vector<16x16xf32>
    %416 = arith.addf %410, %415 : vector<16x16xf32>
    %c2_214 = arith.constant 2 : index
    %c0_215 = arith.constant 0 : index
    %c0_216 = arith.constant 0 : index
    %417 = vector.load %arg19[%c2_214, %c0_215, %c0_216] : memref<16x16x16xf32, #tpu.memory_space<vmem>>, vector<1x16x16xf32>
    %418 = vector.shape_cast %417 : vector<1x16x16xf32> to vector<16x16xf32>
    %419 = vector.extract_strided_slice %403 {offsets = [2, 0], sizes = [1, 1], strides = [1, 1]} : vector<16x1xf32> to vector<1x1xf32>
    %420 = vector.broadcast %419 : vector<1x1xf32> to vector<16x16xf32>
    %421 = arith.mulf %418, %420 : vector<16x16xf32>
    %422 = arith.addf %416, %421 : vector<16x16xf32>
    %c3_217 = arith.constant 3 : index
    %c0_218 = arith.constant 0 : index
    %c0_219 = arith.constant 0 : index
    %423 = vector.load %arg19[%c3_217, %c0_218, %c0_219] : memref<16x16x16xf32, #tpu.memory_space<vmem>>, vector<1x16x16xf32>
    %424 = vector.shape_cast %423 : vector<1x16x16xf32> to vector<16x16xf32>
    %425 = vector.extract_strided_slice %403 {offsets = [3, 0], sizes = [1, 1], strides = [1, 1]} : vector<16x1xf32> to vector<1x1xf32>
    %426 = vector.broadcast %425 : vector<1x1xf32> to vector<16x16xf32>
    %427 = arith.mulf %424, %426 : vector<16x16xf32>
    %428 = arith.addf %422, %427 : vector<16x16xf32>
    %c4_220 = arith.constant 4 : index
    %c0_221 = arith.constant 0 : index
    %c0_222 = arith.constant 0 : index
    %429 = vector.load %arg19[%c4_220, %c0_221, %c0_222] : memref<16x16x16xf32, #tpu.memory_space<vmem>>, vector<1x16x16xf32>
    %430 = vector.shape_cast %429 : vector<1x16x16xf32> to vector<16x16xf32>
    %431 = vector.extract_strided_slice %403 {offsets = [4, 0], sizes = [1, 1], strides = [1, 1]} : vector<16x1xf32> to vector<1x1xf32>
    %432 = vector.broadcast %431 : vector<1x1xf32> to vector<16x16xf32>
    %433 = arith.mulf %430, %432 : vector<16x16xf32>
    %434 = arith.addf %428, %433 : vector<16x16xf32>
    %c5_223 = arith.constant 5 : index
    %c0_224 = arith.constant 0 : index
    %c0_225 = arith.constant 0 : index
    %435 = vector.load %arg19[%c5_223, %c0_224, %c0_225] : memref<16x16x16xf32, #tpu.memory_space<vmem>>, vector<1x16x16xf32>
    %436 = vector.shape_cast %435 : vector<1x16x16xf32> to vector<16x16xf32>
    %437 = vector.extract_strided_slice %403 {offsets = [5, 0], sizes = [1, 1], strides = [1, 1]} : vector<16x1xf32> to vector<1x1xf32>
    %438 = vector.broadcast %437 : vector<1x1xf32> to vector<16x16xf32>
    %439 = arith.mulf %436, %438 : vector<16x16xf32>
    %440 = arith.addf %434, %439 : vector<16x16xf32>
    %c6_226 = arith.constant 6 : index
    %c0_227 = arith.constant 0 : index
    %c0_228 = arith.constant 0 : index
    %441 = vector.load %arg19[%c6_226, %c0_227, %c0_228] : memref<16x16x16xf32, #tpu.memory_space<vmem>>, vector<1x16x16xf32>
    %442 = vector.shape_cast %441 : vector<1x16x16xf32> to vector<16x16xf32>
    %443 = vector.extract_strided_slice %403 {offsets = [6, 0], sizes = [1, 1], strides = [1, 1]} : vector<16x1xf32> to vector<1x1xf32>
    %444 = vector.broadcast %443 : vector<1x1xf32> to vector<16x16xf32>
    %445 = arith.mulf %442, %444 : vector<16x16xf32>
    %446 = arith.addf %440, %445 : vector<16x16xf32>
    %c7_229 = arith.constant 7 : index
    %c0_230 = arith.constant 0 : index
    %c0_231 = arith.constant 0 : index
    %447 = vector.load %arg19[%c7_229, %c0_230, %c0_231] : memref<16x16x16xf32, #tpu.memory_space<vmem>>, vector<1x16x16xf32>
    %448 = vector.shape_cast %447 : vector<1x16x16xf32> to vector<16x16xf32>
    %449 = vector.extract_strided_slice %403 {offsets = [7, 0], sizes = [1, 1], strides = [1, 1]} : vector<16x1xf32> to vector<1x1xf32>
    %450 = vector.broadcast %449 : vector<1x1xf32> to vector<16x16xf32>
    %451 = arith.mulf %448, %450 : vector<16x16xf32>
    %452 = arith.addf %446, %451 : vector<16x16xf32>
    %c8_232 = arith.constant 8 : index
    %c0_233 = arith.constant 0 : index
    %c0_234 = arith.constant 0 : index
    %453 = vector.load %arg19[%c8_232, %c0_233, %c0_234] : memref<16x16x16xf32, #tpu.memory_space<vmem>>, vector<1x16x16xf32>
    %454 = vector.shape_cast %453 : vector<1x16x16xf32> to vector<16x16xf32>
    %455 = vector.extract_strided_slice %403 {offsets = [8, 0], sizes = [1, 1], strides = [1, 1]} : vector<16x1xf32> to vector<1x1xf32>
    %456 = vector.broadcast %455 : vector<1x1xf32> to vector<16x16xf32>
    %457 = arith.mulf %454, %456 : vector<16x16xf32>
    %458 = arith.addf %452, %457 : vector<16x16xf32>
    %c9_235 = arith.constant 9 : index
    %c0_236 = arith.constant 0 : index
    %c0_237 = arith.constant 0 : index
    %459 = vector.load %arg19[%c9_235, %c0_236, %c0_237] : memref<16x16x16xf32, #tpu.memory_space<vmem>>, vector<1x16x16xf32>
    %460 = vector.shape_cast %459 : vector<1x16x16xf32> to vector<16x16xf32>
    %461 = vector.extract_strided_slice %403 {offsets = [9, 0], sizes = [1, 1], strides = [1, 1]} : vector<16x1xf32> to vector<1x1xf32>
    %462 = vector.broadcast %461 : vector<1x1xf32> to vector<16x16xf32>
    %463 = arith.mulf %460, %462 : vector<16x16xf32>
    %464 = arith.addf %458, %463 : vector<16x16xf32>
    %c10_238 = arith.constant 10 : index
    %c0_239 = arith.constant 0 : index
    %c0_240 = arith.constant 0 : index
    %465 = vector.load %arg19[%c10_238, %c0_239, %c0_240] : memref<16x16x16xf32, #tpu.memory_space<vmem>>, vector<1x16x16xf32>
    %466 = vector.shape_cast %465 : vector<1x16x16xf32> to vector<16x16xf32>
    %467 = vector.extract_strided_slice %403 {offsets = [10, 0], sizes = [1, 1], strides = [1, 1]} : vector<16x1xf32> to vector<1x1xf32>
    %468 = vector.broadcast %467 : vector<1x1xf32> to vector<16x16xf32>
    %469 = arith.mulf %466, %468 : vector<16x16xf32>
    %470 = arith.addf %464, %469 : vector<16x16xf32>
    %c11_241 = arith.constant 11 : index
    %c0_242 = arith.constant 0 : index
    %c0_243 = arith.constant 0 : index
    %471 = vector.load %arg19[%c11_241, %c0_242, %c0_243] : memref<16x16x16xf32, #tpu.memory_space<vmem>>, vector<1x16x16xf32>
    %472 = vector.shape_cast %471 : vector<1x16x16xf32> to vector<16x16xf32>
    %473 = vector.extract_strided_slice %403 {offsets = [11, 0], sizes = [1, 1], strides = [1, 1]} : vector<16x1xf32> to vector<1x1xf32>
    %474 = vector.broadcast %473 : vector<1x1xf32> to vector<16x16xf32>
    %475 = arith.mulf %472, %474 : vector<16x16xf32>
    %476 = arith.addf %470, %475 : vector<16x16xf32>
    %c12_244 = arith.constant 12 : index
    %c0_245 = arith.constant 0 : index
    %c0_246 = arith.constant 0 : index
    %477 = vector.load %arg19[%c12_244, %c0_245, %c0_246] : memref<16x16x16xf32, #tpu.memory_space<vmem>>, vector<1x16x16xf32>
    %478 = vector.shape_cast %477 : vector<1x16x16xf32> to vector<16x16xf32>
    %479 = vector.extract_strided_slice %403 {offsets = [12, 0], sizes = [1, 1], strides = [1, 1]} : vector<16x1xf32> to vector<1x1xf32>
    %480 = vector.broadcast %479 : vector<1x1xf32> to vector<16x16xf32>
    %481 = arith.mulf %478, %480 : vector<16x16xf32>
    %482 = arith.addf %476, %481 : vector<16x16xf32>
    %c13_247 = arith.constant 13 : index
    %c0_248 = arith.constant 0 : index
    %c0_249 = arith.constant 0 : index
    %483 = vector.load %arg19[%c13_247, %c0_248, %c0_249] : memref<16x16x16xf32, #tpu.memory_space<vmem>>, vector<1x16x16xf32>
    %484 = vector.shape_cast %483 : vector<1x16x16xf32> to vector<16x16xf32>
    %485 = vector.extract_strided_slice %403 {offsets = [13, 0], sizes = [1, 1], strides = [1, 1]} : vector<16x1xf32> to vector<1x1xf32>
    %486 = vector.broadcast %485 : vector<1x1xf32> to vector<16x16xf32>
    %487 = arith.mulf %484, %486 : vector<16x16xf32>
    %488 = arith.addf %482, %487 : vector<16x16xf32>
    %c14_250 = arith.constant 14 : index
    %c0_251 = arith.constant 0 : index
    %c0_252 = arith.constant 0 : index
    %489 = vector.load %arg19[%c14_250, %c0_251, %c0_252] : memref<16x16x16xf32, #tpu.memory_space<vmem>>, vector<1x16x16xf32>
    %490 = vector.shape_cast %489 : vector<1x16x16xf32> to vector<16x16xf32>
    %491 = vector.extract_strided_slice %403 {offsets = [14, 0], sizes = [1, 1], strides = [1, 1]} : vector<16x1xf32> to vector<1x1xf32>
    %492 = vector.broadcast %491 : vector<1x1xf32> to vector<16x16xf32>
    %493 = arith.mulf %490, %492 : vector<16x16xf32>
    %494 = arith.addf %488, %493 : vector<16x16xf32>
    %c15_253 = arith.constant 15 : index
    %c0_254 = arith.constant 0 : index
    %c0_255 = arith.constant 0 : index
    %495 = vector.load %arg19[%c15_253, %c0_254, %c0_255] : memref<16x16x16xf32, #tpu.memory_space<vmem>>, vector<1x16x16xf32>
    %496 = vector.shape_cast %495 : vector<1x16x16xf32> to vector<16x16xf32>
    %497 = vector.extract_strided_slice %403 {offsets = [15, 0], sizes = [1, 1], strides = [1, 1]} : vector<16x1xf32> to vector<1x1xf32>
    %498 = vector.broadcast %497 : vector<1x1xf32> to vector<16x16xf32>
    %499 = arith.mulf %496, %498 : vector<16x16xf32>
    %500 = arith.addf %494, %499 : vector<16x16xf32>
    %c0_256 = arith.constant 0 : index
    %c16_257 = arith.constant 16 : index
    %501 = vector.load %arg26[%c0_256, %c16_257] : memref<16x32xf32, #tpu.memory_space<vmem>>, vector<16x16xf32>
    tpu.vector_store %arg26[%c0_256, %c16_257], %500 {strides = array<i32>} : memref<16x32xf32, #tpu.memory_space<vmem>>, vector<16x16xf32>,
    %c0_258 = arith.constant 0 : index
    %c0_259 = arith.constant 0 : index
    %502 = vector.load %arg26[%c0_258, %c0_259] : memref<16x32xf32, #tpu.memory_space<vmem>>, vector<16x32xf32>
    %cst_260 = arith.constant 0.000000e+00 : f32
    %503 = vector.broadcast %cst_260 : f32 to vector<48x32xf32>
    %c0_261 = arith.constant 0 : index
    %c0_262 = arith.constant 0 : index
    %504 = vector.load %arg24[%c0_261, %c0_262] : memref<48x32xf32, #tpu.memory_space<vmem>>, vector<48x32xf32>
    tpu.vector_store %arg24[%c0_261, %c0_262], %503 {strides = array<i32>} : memref<48x32xf32, #tpu.memory_space<vmem>>, vector<48x32xf32>,
    %505 = vector.extract_strided_slice %502 {offsets = [0, 0], sizes = [16, 15], strides = [1, 1]} : vector<16x32xf32> to vector<16x15xf32>
    %c0_263 = arith.constant 0 : index
    %c1_264 = arith.constant 1 : index
    %506 = vector.load %arg24[%c0_263, %c1_264] : memref<48x32xf32, #tpu.memory_space<vmem>>, vector<16x15xf32>
    tpu.vector_store %arg24[%c0_263, %c1_264], %505 {strides = array<i32>} : memref<48x32xf32, #tpu.memory_space<vmem>>, vector<16x15xf32>,
    %507 = vector.extract_strided_slice %502 {offsets = [0, 16], sizes = [16, 15], strides = [1, 1]} : vector<16x32xf32> to vector<16x15xf32>
    %c0_265 = arith.constant 0 : index
    %c17_266 = arith.constant 17 : index
    %508 = vector.load %arg24[%c0_265, %c17_266] : memref<48x32xf32, #tpu.memory_space<vmem>>, vector<16x15xf32>
    tpu.vector_store %arg24[%c0_265, %c17_266], %507 {strides = array<i32>} : memref<48x32xf32, #tpu.memory_space<vmem>>, vector<16x15xf32>,
    %509 = vector.extract_strided_slice %502 {offsets = [0, 0], sizes = [16, 16], strides = [1, 1]} : vector<16x32xf32> to vector<16x16xf32>
    %c16_267 = arith.constant 16 : index
    %c0_268 = arith.constant 0 : index
    %510 = vector.load %arg24[%c16_267, %c0_268] : memref<48x32xf32, #tpu.memory_space<vmem>>, vector<16x16xf32>
    tpu.vector_store %arg24[%c16_267, %c0_268], %509 {strides = array<i32>} : memref<48x32xf32, #tpu.memory_space<vmem>>, vector<16x16xf32>,
    %511 = vector.extract_strided_slice %502 {offsets = [0, 16], sizes = [16, 16], strides = [1, 1]} : vector<16x32xf32> to vector<16x16xf32>
    %c16_269 = arith.constant 16 : index
    %c16_270 = arith.constant 16 : index
    %512 = vector.load %arg24[%c16_269, %c16_270] : memref<48x32xf32, #tpu.memory_space<vmem>>, vector<16x16xf32>
    tpu.vector_store %arg24[%c16_269, %c16_270], %511 {strides = array<i32>} : memref<48x32xf32, #tpu.memory_space<vmem>>, vector<16x16xf32>,
    %513 = vector.extract_strided_slice %502 {offsets = [0, 1], sizes = [16, 15], strides = [1, 1]} : vector<16x32xf32> to vector<16x15xf32>
    %c32 = arith.constant 32 : index
    %c0_271 = arith.constant 0 : index
    %514 = vector.load %arg24[%c32, %c0_271] : memref<48x32xf32, #tpu.memory_space<vmem>>, vector<16x15xf32>
    tpu.vector_store %arg24[%c32, %c0_271], %513 {strides = array<i32>} : memref<48x32xf32, #tpu.memory_space<vmem>>, vector<16x15xf32>,
    %515 = vector.extract_strided_slice %502 {offsets = [0, 17], sizes = [16, 15], strides = [1, 1]} : vector<16x32xf32> to vector<16x15xf32>
    %c32_272 = arith.constant 32 : index
    %c16_273 = arith.constant 16 : index
    %516 = vector.load %arg24[%c32_272, %c16_273] : memref<48x32xf32, #tpu.memory_space<vmem>>, vector<16x15xf32>
    tpu.vector_store %arg24[%c32_272, %c16_273], %515 {strides = array<i32>} : memref<48x32xf32, #tpu.memory_space<vmem>>, vector<16x15xf32>,
    %c0_274 = arith.constant 0 : index
    %c0_275 = arith.constant 0 : index
    %517 = vector.load %arg24[%c0_274, %c0_275] : memref<48x32xf32, #tpu.memory_space<vmem>>, vector<48x32xf32>
    %c0_276 = arith.constant 0 : index
    %c0_277 = arith.constant 0 : index
    %518 = vector.load %arg9[%c0_276, %c0_277] : memref<8x48xf32, #tpu.memory_space<vmem>>, vector<8x48xf32>
    %cst_278 = arith.constant dense<0.000000e+00> : vector<8x32xf32>
    %519 = tpu.matmul %518, %517, %cst_278 {dimension_numbers = #tpu.dot_dimension_numbers<[1], [0], [0], [1], [0, 0, 1, 1], [], []>} : vector<8x48xf32>, vector<48x32xf32>, vector<8x32xf32> -> vector<8x32xf32>
    %c0_279 = arith.constant 0 : index
    %c0_280 = arith.constant 0 : index
    %520 = vector.load %arg10[%c0_279, %c0_280] : memref<8x1xf32, #tpu.memory_space<vmem>>, vector<8x1xf32>
    %521 = vector.broadcast %520 : vector<8x1xf32> to vector<8x32xf32>
    %522 = arith.addf %519, %521 : vector<8x32xf32>
    %cst_281 = arith.constant dense<0.000000e+00> : vector<8xf32>
    %523 = vector.multi_reduction <add>, %522, %cst_281 [1] : vector<8x32xf32> to vector<8xf32>
    %524 = vector.shape_cast %523 : vector<8xf32> to vector<8x1xf32>
    %cst_282 = arith.constant 3.125000e-02 : f32
    %525 = vector.broadcast %cst_282 : f32 to vector<8x1xf32>
    %526 = arith.mulf %524, %525 : vector<8x1xf32>
    %527 = vector.broadcast %526 : vector<8x1xf32> to vector<8x32xf32>
    %528 = arith.subf %522, %527 : vector<8x32xf32>
    %529 = arith.mulf %528, %528 : vector<8x32xf32>
    %cst_283 = arith.constant dense<0.000000e+00> : vector<8xf32>
    %530 = vector.multi_reduction <add>, %529, %cst_283 [1] : vector<8x32xf32> to vector<8xf32>
    %531 = vector.shape_cast %530 : vector<8xf32> to vector<8x1xf32>
    %cst_284 = arith.constant 3.125000e-02 : f32
    %532 = vector.broadcast %cst_284 : f32 to vector<8x1xf32>
    %533 = arith.mulf %531, %532 : vector<8x1xf32>
    %cst_285 = arith.constant 9.99999974E-6 : f32
    %534 = vector.broadcast %cst_285 : f32 to vector<8x1xf32>
    %535 = arith.addf %533, %534 : vector<8x1xf32>
    %536 = math.rsqrt %535 : vector<8x1xf32>
    %c0_286 = arith.constant 0 : index
    %c0_287 = arith.constant 0 : index
    %537 = vector.load %arg11[%c0_286, %c0_287] : memref<8x1xf32, #tpu.memory_space<vmem>>, vector<8x1xf32>
    %538 = arith.mulf %536, %537 : vector<8x1xf32>
    %539 = vector.broadcast %538 : vector<8x1xf32> to vector<8x32xf32>
    %540 = arith.mulf %528, %539 : vector<8x32xf32>
    %c0_288 = arith.constant 0 : index
    %c0_289 = arith.constant 0 : index
    %541 = vector.load %arg12[%c0_288, %c0_289] : memref<8x1xf32, #tpu.memory_space<vmem>>, vector<8x1xf32>
    %542 = vector.broadcast %541 : vector<8x1xf32> to vector<8x32xf32>
    %543 = arith.addf %540, %542 : vector<8x32xf32>
    %cst_290 = arith.constant 0.000000e+00 : f32
    %544 = vector.broadcast %cst_290 : f32 to vector<8x32xf32>
    %545 = arith.maximumf %543, %544 : vector<8x32xf32>
    %cst_291 = arith.constant 0.000000e+00 : f32
    %546 = vector.broadcast %cst_291 : f32 to vector<24x32xf32>
    %c0_292 = arith.constant 0 : index
    %c0_293 = arith.constant 0 : index
    %547 = vector.load %arg25[%c0_292, %c0_293] : memref<24x32xf32, #tpu.memory_space<vmem>>, vector<24x32xf32>
    tpu.vector_store %arg25[%c0_292, %c0_293], %546 {strides = array<i32>} : memref<24x32xf32, #tpu.memory_space<vmem>>, vector<24x32xf32>,
    %548 = vector.extract_strided_slice %545 {offsets = [0, 0], sizes = [8, 14], strides = [1, 1]} : vector<8x32xf32> to vector<8x14xf32>
    %c0_294 = arith.constant 0 : index
    %c2_295 = arith.constant 2 : index
    %549 = vector.load %arg25[%c0_294, %c2_295] : memref<24x32xf32, #tpu.memory_space<vmem>>, vector<8x14xf32>
    tpu.vector_store %arg25[%c0_294, %c2_295], %548 {strides = array<i32>} : memref<24x32xf32, #tpu.memory_space<vmem>>, vector<8x14xf32>,
    %550 = vector.extract_strided_slice %545 {offsets = [0, 16], sizes = [8, 14], strides = [1, 1]} : vector<8x32xf32> to vector<8x14xf32>
    %c0_296 = arith.constant 0 : index
    %c18_297 = arith.constant 18 : index
    %551 = vector.load %arg25[%c0_296, %c18_297] : memref<24x32xf32, #tpu.memory_space<vmem>>, vector<8x14xf32>
    tpu.vector_store %arg25[%c0_296, %c18_297], %550 {strides = array<i32>} : memref<24x32xf32, #tpu.memory_space<vmem>>, vector<8x14xf32>,
    %552 = vector.extract_strided_slice %545 {offsets = [0, 0], sizes = [8, 16], strides = [1, 1]} : vector<8x32xf32> to vector<8x16xf32>
    %c8_298 = arith.constant 8 : index
    %c0_299 = arith.constant 0 : index
    %553 = vector.load %arg25[%c8_298, %c0_299] : memref<24x32xf32, #tpu.memory_space<vmem>>, vector<8x16xf32>
    tpu.vector_store %arg25[%c8_298, %c0_299], %552 {strides = array<i32>} : memref<24x32xf32, #tpu.memory_space<vmem>>, vector<8x16xf32>,
    %554 = vector.extract_strided_slice %545 {offsets = [0, 16], sizes = [8, 16], strides = [1, 1]} : vector<8x32xf32> to vector<8x16xf32>
    %c8_300 = arith.constant 8 : index
    %c16_301 = arith.constant 16 : index
    %555 = vector.load %arg25[%c8_300, %c16_301] : memref<24x32xf32, #tpu.memory_space<vmem>>, vector<8x16xf32>
    tpu.vector_store %arg25[%c8_300, %c16_301], %554 {strides = array<i32>} : memref<24x32xf32, #tpu.memory_space<vmem>>, vector<8x16xf32>,
    %556 = vector.extract_strided_slice %545 {offsets = [0, 2], sizes = [8, 14], strides = [1, 1]} : vector<8x32xf32> to vector<8x14xf32>
    %c16_302 = arith.constant 16 : index
    %c0_303 = arith.constant 0 : index
    %557 = vector.load %arg25[%c16_302, %c0_303] : memref<24x32xf32, #tpu.memory_space<vmem>>, vector<8x14xf32>
    tpu.vector_store %arg25[%c16_302, %c0_303], %556 {strides = array<i32>} : memref<24x32xf32, #tpu.memory_space<vmem>>, vector<8x14xf32>,
    %558 = vector.extract_strided_slice %545 {offsets = [0, 18], sizes = [8, 14], strides = [1, 1]} : vector<8x32xf32> to vector<8x14xf32>
    %c16_304 = arith.constant 16 : index
    %c16_305 = arith.constant 16 : index
    %559 = vector.load %arg25[%c16_304, %c16_305] : memref<24x32xf32, #tpu.memory_space<vmem>>, vector<8x14xf32>
    tpu.vector_store %arg25[%c16_304, %c16_305], %558 {strides = array<i32>} : memref<24x32xf32, #tpu.memory_space<vmem>>, vector<8x14xf32>,
    %c0_306 = arith.constant 0 : index
    %c0_307 = arith.constant 0 : index
    %560 = vector.load %arg25[%c0_306, %c0_307] : memref<24x32xf32, #tpu.memory_space<vmem>>, vector<24x32xf32>
    %c0_308 = arith.constant 0 : index
    %c0_309 = arith.constant 0 : index
    %561 = vector.load %arg13[%c0_308, %c0_309] : memref<1x24xf32, #tpu.memory_space<vmem>>, vector<1x24xf32>
    %cst_310 = arith.constant dense<0.000000e+00> : vector<1x32xf32>
    %562 = tpu.matmul %561, %560, %cst_310 {dimension_numbers = #tpu.dot_dimension_numbers<[1], [0], [0], [1], [0, 0, 1, 1], [], []>} : vector<1x24xf32>, vector<24x32xf32>, vector<1x32xf32> -> vector<1x32xf32>
    %c0_311 = arith.constant 0 : index
    %c0_312 = arith.constant 0 : index
    %563 = vector.load %arg14[%c0_311, %c0_312] : memref<1x1xf32, #tpu.memory_space<vmem>>, vector<1x1xf32>
    %564 = vector.broadcast %563 : vector<1x1xf32> to vector<1x32xf32>
    %565 = arith.addf %562, %564 : vector<1x32xf32>
    %cst_313 = arith.constant dense<0.000000e+00> : vector<1xf32>
    %566 = vector.multi_reduction <add>, %565, %cst_313 [1] : vector<1x32xf32> to vector<1xf32>
    %567 = vector.shape_cast %566 : vector<1xf32> to vector<1x1xf32>
    %cst_314 = arith.constant 3.125000e-02 : f32
    %568 = vector.broadcast %cst_314 : f32 to vector<1x1xf32>
    %569 = arith.mulf %567, %568 : vector<1x1xf32>
    %570 = vector.broadcast %569 : vector<1x1xf32> to vector<1x32xf32>
    %571 = arith.subf %565, %570 : vector<1x32xf32>
    %572 = arith.mulf %571, %571 : vector<1x32xf32>
    %cst_315 = arith.constant dense<0.000000e+00> : vector<1xf32>
    %573 = vector.multi_reduction <add>, %572, %cst_315 [1] : vector<1x32xf32> to vector<1xf32>
    %574 = vector.shape_cast %573 : vector<1xf32> to vector<1x1xf32>
    %cst_316 = arith.constant 3.125000e-02 : f32
    %575 = vector.broadcast %cst_316 : f32 to vector<1x1xf32>
    %576 = arith.mulf %574, %575 : vector<1x1xf32>
    %cst_317 = arith.constant 9.99999974E-6 : f32
    %577 = vector.broadcast %cst_317 : f32 to vector<1x1xf32>
    %578 = arith.addf %576, %577 : vector<1x1xf32>
    %579 = math.rsqrt %578 : vector<1x1xf32>
    %c0_318 = arith.constant 0 : index
    %c0_319 = arith.constant 0 : index
    %580 = vector.load %arg15[%c0_318, %c0_319] : memref<1x1xf32, #tpu.memory_space<vmem>>, vector<1x1xf32>
    %581 = arith.mulf %579, %580 : vector<1x1xf32>
    %582 = vector.broadcast %581 : vector<1x1xf32> to vector<1x32xf32>
    %583 = arith.mulf %571, %582 : vector<1x32xf32>
    %c0_320 = arith.constant 0 : index
    %c0_321 = arith.constant 0 : index
    %584 = vector.load %arg16[%c0_320, %c0_321] : memref<1x1xf32, #tpu.memory_space<vmem>>, vector<1x1xf32>
    %585 = vector.broadcast %584 : vector<1x1xf32> to vector<1x32xf32>
    %586 = arith.addf %583, %585 : vector<1x32xf32>
    %cst_322 = arith.constant 0.000000e+00 : f32
    %587 = vector.broadcast %cst_322 : f32 to vector<1x32xf32>
    %588 = arith.maximumf %586, %587 : vector<1x32xf32>
    %589 = vector.extract_strided_slice %588 {offsets = [0, 0], sizes = [1, 16], strides = [1, 1]} : vector<1x32xf32> to vector<1x16xf32>
    %c0_323 = arith.constant 0 : index
    %c0_324 = arith.constant 0 : index
    %c0_325 = arith.constant 0 : index
    %590 = vector.load %arg21[%c0_323, %c0_324, %c0_325] : memref<2x1x16xf32, #tpu.memory_space<vmem>>, vector<1x1x16xf32>
    %591 = vector.shape_cast %590 : vector<1x1x16xf32> to vector<1x16xf32>
    %592 = vector.shape_cast %589 : vector<1x16xf32> to vector<1x1x16xf32>
    tpu.vector_store %arg21[%c0_323, %c0_324, %c0_325], %592 {strides = array<i32>} : memref<2x1x16xf32, #tpu.memory_space<vmem>>, vector<1x1x16xf32>,
    %593 = vector.extract_strided_slice %588 {offsets = [0, 16], sizes = [1, 16], strides = [1, 1]} : vector<1x32xf32> to vector<1x16xf32>
    %c1_326 = arith.constant 1 : index
    %c0_327 = arith.constant 0 : index
    %c0_328 = arith.constant 0 : index
    %594 = vector.load %arg21[%c1_326, %c0_327, %c0_328] : memref<2x1x16xf32, #tpu.memory_space<vmem>>, vector<1x1x16xf32>
    %595 = vector.shape_cast %594 : vector<1x1x16xf32> to vector<1x16xf32>
    %596 = vector.shape_cast %593 : vector<1x16xf32> to vector<1x1x16xf32>
    tpu.vector_store %arg21[%c1_326, %c0_327, %c0_328], %596 {strides = array<i32>} : memref<2x1x16xf32, #tpu.memory_space<vmem>>, vector<1x1x16xf32>,
    return
  }
}

</mosaic_0001>

<bundles_post_ra>
// kernel: tpu_custom_call.1
= control target key start
LH: loop header
LB: loop body
LE: loop exit
PB: predicated region body
PF: predicated region fallthrough
CT: control target
= control target key end

     0   :  { %s2276_s0 = inlined_call_operand.vmem [shape: f32[1,32], index: 0, kind: input, shape index: {}]   ;;  %s2277_s1 = inlined_call_operand.vmem [shape: f32[8,3], index: 1, kind: input, shape index: {}]   ;;  %s2278_s2 = inlined_call_operand.vmem [shape: f32[8,1], index: 2, kind: input, shape index: {}]   ;;  %s2279_s3 = inlined_call_operand.vmem [shape: f32[8,1], index: 3, kind: input, shape index: {}]   ;;  %s2280_s4 = inlined_call_operand.vmem [shape: f32[8,1], index: 4, kind: input, shape index: {}]   ;;  %s2281_s5 = inlined_call_operand.vmem [shape: f32[16,24], index: 5, kind: input, shape index: {}]   ;;  %s2282_s6 = inlined_call_operand.vmem [shape: f32[16,1], index: 6, kind: input, shape index: {}]   ;;  %s2283_s7 = inlined_call_operand.vmem [shape: f32[16,1], index: 7, kind: input, shape index: {}]   ;;  %s2284_s8 = inlined_call_operand.vmem [shape: f32[16,1], index: 8, kind: input, shape index: {}]   ;;  %s2285_s9 = inlined_call_operand.vmem [shape: f32[8,48], index: 9, kind: input, shape index: {}]   ;;  %s2286_s10 = inlined_call_operand.vmem [shape: f32[8,1], index: 10, kind: input, shape index: {}]   ;;  %s2287_s11 = inlined_call_operand.vmem [shape: f32[8,1], index: 11, kind: input, shape index: {}]   ;;  %s2288_s12 = inlined_call_operand.vmem [shape: f32[8,1], index: 12, kind: input, shape index: {}]   ;;  %s2289_s13 = inlined_call_operand.vmem [shape: f32[1,24], index: 13, kind: input, shape index: {}]   ;;  %s2290_s14 = inlined_call_operand.<no memory space> [shape: f32[1,1], index: 14, kind: input, shape index: {}]   ;;  %s2291_s17 = inlined_call_operand.hbm [shape: f32[16,16,16], index: 17, kind: input, shape index: {}]   ;;  %s2292_s18 = inlined_call_operand.vmem [shape: f32[16,1], index: 18, kind: input, shape index: {}]   ;;  %s2293_s19 = inlined_call_operand.hbm [shape: f32[16,16,16], index: 19, kind: input, shape index: {}]   ;;  %s2294_s20 = inlined_call_operand.vmem [shape: f32[16,16], index: 20, kind: input, shape index: {}]   ;;  %s2295_s21 = inlined_call_operand.hbm [shape: f32[2,1,16], index: 21, kind: output, shape index: {}]   ;;  %s2296_s15 = inlined_call_operand.<no memory space> [shape: f32[1,1], index: 15, kind: input, shape index: {}]   ;;  %s2297_s16 = inlined_call_operand.<no memory space> [shape: f32[1,1], index: 16, kind: input, shape index: {}]  }
   0x1   :  { %2299 = sst [smem:[#allocation19_spill]] %s2276_s0  ;;  %v26_v0 = vstv %s2290_s14  ;;  %v28_v1 = vstv %s2296_s15  ;;  %v30_v2 = vstv %s2297_s16 }
   0x2   :  { %2300 = sst [smem:[#allocation20_spill]] %s2277_s1  ;;  %27 = vst [vmem:[#allocation7] sm:$0x1] %v26_v0  ;;  %29 = vst [vmem:[#allocation8] sm:$0x1] %v28_v1 }
   0x3   :  { %2301 = sst [smem:[#allocation21_spill]] %s2278_s2  ;;  %31 = vst [vmem:[#allocation9] sm:$0x1] %v30_v2 }
   0x4   :  { %2302 = sst [smem:[#allocation22_spill]] %s2279_s3 }
   0x5   :  { %2303 = sst [smem:[#allocation23_spill]] %s2280_s4 }
   0x6   :  { %2304 = sst [smem:[#allocation24_spill]] %s2281_s5 }
   0x7   :  { %32 = vsyncpa [#allocation11], 0 }
   0x8   :  { %33 = vsyncpa [#allocation14], 0 }
   0x9   :  { %34 = vsyncpa [#allocation12], 0  ;;  %s1632_s29 = smov [#allocation10]   ;;  %s1560_s14 = scalar_lea.hbm %s2291_s17, 4096 }
   0xa   :  { %s74_s0 = sshll.u32 %s1632_s29, 4  ;;  %p1561_p0 = scmp.ne.s32.totalorder %s2291_s17, %s1560_s14  ;;  %s75_s0 = int_to_ptr.vmem [resolvable:$true] %s74_s0 }
   0xb   :  { %p1564_p1 = scmp.lt.u32.totalorder %s1560_s14, %s2291_s17 }
   0xd   :  { %p1566_p2 = pnand %p1564_p1, %p1561_p0 }
   0xf   :  { %1569 = shalt.err (!%p1566_p2)
}
  0x10   :  { %s1570_s16 = scalar_lea.vmem %s75_s0, 4096  ;;  %p1575_p4 = scmp.lt.s32.totalorder %s75_s0, %s75_s0 }
  0x11   :  { %p1571_p3 = scmp.ne.s32.totalorder %s75_s0, %s1570_s16  ;;  %p1576_p5 = scmp.lt.s32.totalorder %s1570_s16, %s1570_s16 }
  0x13   :  { %p1577_p6 = por %p1576_p5, %p1575_p4 }
  0x15   :  { %p1578_p7 = pnand %p1577_p6, %p1571_p3 }
  0x17   :  { %1581 = shalt.err (!%p1578_p7)
}
  0x18   :  { %s1633_s1 = smov 128   ;;  %s1634_s24 = smov 8  }
  0x19   :  { %80 = dma.hbm_to_vmem [thread:$0]  %s2291_s17, 4096, %s75_s0, [#allocation11], %s1633_s1, %s1633_s1, %s1634_s24  }
  0x1a   :  { %s1635_s26 = smov [#allocation13]   ;;  %s1582_s29 = scalar_lea.hbm %s2293_s19, 4096 }
  0x1b   :  { %s88_s27 = sshll.u32 %s1635_s26, 4  ;;  %p1583_p8 = scmp.ne.s32.totalorder %s2293_s19, %s1582_s29  ;;  %s89_s27 = int_to_ptr.vmem [resolvable:$true] %s88_s27 }
  0x1c   :  { %p1586_p9 = scmp.lt.u32.totalorder %s1582_s29, %s2293_s19 }
  0x1e   :  { %p1588_p10 = pnand %p1586_p9, %p1583_p8 }
  0x20   :  { %1591 = shalt.err (!%p1588_p10)
}
  0x21   :  { %s1592_s22 = scalar_lea.vmem %s89_s27, 4096  ;;  %p1597_p12 = scmp.lt.s32.totalorder %s89_s27, %s89_s27 }
  0x22   :  { %p1593_p11 = scmp.ne.s32.totalorder %s89_s27, %s1592_s22  ;;  %p1598_p13 = scmp.lt.s32.totalorder %s1592_s22, %s1592_s22 }
  0x24   :  { %p1599_p0 = por %p1598_p13, %p1597_p12 }
  0x26   :  { %p1600_p1 = pnand %p1599_p0, %p1593_p11 }
  0x28   :  { %1603 = shalt.err (!%p1600_p1)
}
  0x29   :  { %94 = dma.hbm_to_vmem [thread:$0]  %s2293_s19, 4096, %s89_s27, [#allocation14], %s1633_s1, %s1633_s1, %s1634_s24  }
  0x2a   :  { %1626 = dma.done.wait [#allocation11], 4096  }
  0x2b   :  { %1627 = vsyncadd [#allocation11], 4294963200 }
  0x2c   :  { %1628 = dma.done.wait [#allocation14], 4096  }
  0x2d   :  { %1629 = vsyncadd [#allocation14], 4294963200  ;;  %v107_v3 = vlaneseq  ;;  %v1636_v4 = vmov 0   ;;  %vm104_vm0 = vcmask 256000   ;;  %v1637_v6 = vmov 2   ;;  %s2305_s23 = sld [smem:[#allocation20_spill]] }
  0x2e   :  { %1545 = vset.pattern.permute.xlu1 %v1636_v4  ;;  %1547 = vset.pattern.permute.xlu0 %v1637_v6  ;;  %v1638_v7 = vmov 0.0   ;;  %vm118_vm1 = vcmask 122880   ;;  %vm120_vm2 = vcmask 254080   ;;  %s2306_s24 = sld [smem:[#allocation19_spill]]  ;;  %s1639_s2 = smov 1   ;;  %v1640_v12 = vmov 1  }
  0x2f   :  { %v1792_v5 = vshrl.u32 %v107_v3, 7  ;;  %105 = vst.msk [vmem:[#allocation2] sm:$0x7] %vm104_vm0, %v1638_v7  ;;  %s1641_s25 = smov 127   ;;  %s2307_s3 = sld [smem:[#allocation21_spill]]  ;;  %vm169_vm3 = vcmask 261120  }
  0x30   :  { %198 = vst.msk [vmem:[#allocation3] sm:$0xff] %vm169_vm3, %v1638_v7  ;;  %199 = vst.msk [vmem:[#allocation3 + $0x8] sm:$0xff] %vm169_vm3, %v1638_v7  ;;  %vm114_vm4 = vcmask 122888   ;;  %vm116_vm5 = vcmask 254088   ;;  %vm125_vm6 = vcmask 114688   ;;  %vm127_vm7 = vcmask 245888  }
  0x31   :  { %v1796_v8 = vsub.s32 0, %v1792_v5  ;;  %200 = vst.msk [vmem:[#allocation3 + $0x10] sm:$0xff] %vm169_vm3, %v1638_v7  ;;  %1083 = vst.msk [vmem:[#allocation4] sm:$0xff] %vm169_vm3, %v1638_v7  ;;  %v1836_v16 = vsub.s32 1, %v1792_v5  ;;  %v1841_v22 = vsub.s32 2, %v1792_v5  ;;  %s2308_s4 = sld [smem:[#allocation23_spill]] }
  0x32   :  { %1084 = vst.msk [vmem:[#allocation4 + $0x8] sm:$0xff] %vm169_vm3, %v1638_v7  ;;  %1085 = vst.msk [vmem:[#allocation4 + $0x10] sm:$0xff] %vm169_vm3, %v1638_v7  ;;  %s2309_s5 = sld [smem:[#allocation22_spill]]  ;;  %vm209_vm8 = vcmask 130048   ;;  %vm211_vm9 = vcmask 261248   ;;  %s1642_s22 = smov 2  }
  0x33   :  { %v130_v9 = vld [vmem:[%s2305_s23] sm:$0xff]  ;;  %1086 = vst.msk [vmem:[#allocation4 + $0x18] sm:$0xff] %vm169_vm3, %v1638_v7  ;;  %1087 = vst.msk [vmem:[#allocation4 + $0x20] sm:$0xff] %vm169_vm3, %v1638_v7  ;;  %s2310_s19 = sld [smem:[#allocation24_spill]]  ;;  %vm237_vm10 = vcmask 195584   ;;  %s1643_s15 = smov 126  }
  0x34   :  { %v103_v10 = vld [vmem:[%s2306_s24] sm:$0x1]  ;;  %133 = vperm.xlu1 %1545, %v130_v9   ;;  %1088 = vst.msk [vmem:[#allocation4 + $0x28] sm:$0xff] %vm169_vm3, %v1638_v7  ;;  %1234 = vst.msk [vmem:[#allocation5] sm:$0xff] %vm169_vm3, %v1638_v7  ;;  %v226_v52 = vld [vmem:[%s2282_s6 + $0x8] sm:$0xff]  ;;  %vm205_vm11 = vcmask 130064  }
  0x35   :  { %v110_v11 = vrot.slane %v103_v10, %v1796_v8  ;;  %119 = vst.msk [vmem:[#allocation2 + $0x1] sm:$0x1] %vm118_vm1, %v103_v10  ;;  %v162_v13 = vld [vmem:[%s2307_s3] sm:$0xff]  ;;  %vm207_vm12 = vcmask 261264   ;;  %vm216_vm13 = vcmask 113664   ;;  %vm218_vm14 = vcmask 244864  }
  0x36   :  { %121 = vst.msk [vmem:[#allocation2 + $0x1] sm:$0x1] %vm120_vm2, %v103_v10  ;;  %v225_v51 = vld [vmem:[%s2282_s6] sm:$0xff]  ;;  %vm1647_vm15 = vmmov 0   ;;  %vm1097_vm0 = vcmask 130056   ;;  %vm1100_vm2 = vcmask 261256  }
  0x37   :  { %111 = vrot.lane.b32.xlu0 %v110_v11, %s1639_s2  ;;  %1235 = vst.msk [vmem:[#allocation5 + $0x8] sm:$0xff] %vm169_vm3, %v1638_v7  ;;  %1236 = vst.msk [vmem:[#allocation5 + $0x10] sm:$0xff] %vm169_vm3, %v1638_v7  ;;  %v190_v33 = vld [vmem:[%s2308_s4] sm:$0xff]  ;;  %1436 = vmatprep.mubr.msk.f32.mxu1 %vm1647_vm15, %v1638_v7 }
  0x38   :  { %1546 = vset.pattern.permute.xlu1 %v1640_v12  ;;  %v182_v42 = vld [vmem:[%s2309_s5] sm:$0xff] }
  0x39   :  { %143 = vperm.xlu1 %1546, %v130_v9   ;;  %v223_v50 = vld [vmem:[%s2310_s19] sm:$0xff]  ;;  %v224_v59 = vld [vmem:[%s2310_s19 + $0x8] sm:$0xff] }
  0x3a   :  { %1421 = vmatprep.mubr.msk.f32.mxu0 %vm237_vm10, %v223_v50  ;;  %v1907_v50 = vld [vmem:[#allocation10 + $0x28] sm:$0xff] }
  0x3b   :  { %122 = vrot.lane.b32.xlu0 %v110_v11, %s1641_s25 }
  0x3d   :  { %1548 = vset.pattern.permute.xlu1 %v1636_v4 }
  0x3e   :  { %165 = vperm.xlu1 %1548, %v162_v13  }
  0x3f   :  { %153 = vperm.xlu0 %1547, %v130_v9  }
  0x43   :  { %1549 = vset.pattern.permute.xlu0 %v1636_v4 }
  0xa9   :  { %v112_v14 = vpop.permute.xlu0 %111 }
  0xaa   :  { %115 = vst.msk [vmem:[#allocation2] sm:$0x1] %vm114_vm4, %v112_v14  ;;  %vm1113_vm4 = vcmask 121856  }
  0xab   :  { %117 = vst.msk [vmem:[#allocation2] sm:$0x1] %vm116_vm5, %v112_v14  ;;  %vm1116_vm5 = vcmask 253056  }
  0xad   :  { %v123_v15 = vpop.permute.xlu0 %122 }
  0xae   :  { %126 = vst.msk [vmem:[#allocation2 + $0x2] sm:$0x1] %vm125_vm6, %v123_v15  ;;  %vm1132_vm6 = vcmask 392192  }
  0xaf   :  { %128 = vst.msk [vmem:[#allocation2 + $0x2] sm:$0x1] %vm127_vm7, %v123_v15 }
  0xb3   :  { %v134_v17 = vpop.permute.xlu1 %133 }
  0xb6   :  { %v129_v18 = vld [vmem:[#allocation2] sm:$0x7] }
  0xb7   :  { %v139_v19 = vrot.slane %v129_v18, %v1796_v8  ;;  %v149_v20 = vrot.slane %v129_v18, %v1836_v16  ;;  %v159_v25 = vrot.slane %v129_v18, %v1841_v22  ;;  %v359_v18 = vld [vmem:[%s2284_s8] sm:$0xff] }
  0xb8   :  { %v144_v21 = vpop.permute.xlu1 %143 }
  0xb9   :  { %v140_v23 = vmul.f32 %v139_v19, %v134_v17  ;;  %v150_v24 = vmul.f32 %v149_v20, %v144_v21 }
  0xbb   :  { %v151_v27 = vadd.f32 %v150_v24, %v140_v23 }
  0xbd   :  { %v166_v29 = vpop.permute.xlu1 %165 }
  0xbe   :  { %v154_v26 = vpop.permute.xlu0 %153 }
  0xbf   :  { %v160_v28 = vmul.f32 %v159_v25, %v154_v26  ;;  %v343_v26 = vld [vmem:[%s2283_s7] sm:$0xff] }
  0xc1   :  { %v161_v30 = vadd.f32 %v160_v28, %v151_v27 }
  0xc3   :  { %v168_v31 = vadd.f32 %v166_v29, %v161_v30  ;;  %v344_v29 = vld [vmem:[%s2283_s7 + $0x8] sm:$0xff]  ;;  %s1644_s7 = smov 112  }
  0xc5   :  { %v170_v32 = vsel %vm169_vm3, %v168_v31, 0.0 }
  0xc6   :  { %171 = vadd.xlane.f32.xlu1 %v170_v32 }
  0xd7   :  { %193 = vperm.xlu1 %1548, %v190_v33  }
 0x153   :  { %v172_v34 = vpop.xlane.xlu1 %171 }
 0x154   :  { %v173_v35 = vmul.f32 0.03125, %v172_v34 }
 0x156   :  { %v174_v36 = vsub.f32 %v168_v31, %v173_v35  ;;  %v360_v31 = vld [vmem:[%s2284_s8 + $0x8] sm:$0xff] }
 0x157   :  { %v194_v47 = vpop.permute.xlu1 %193 }
 0x158   :  { %v175_v37 = vmul.f32 %v174_v36, %v174_v36 }
 0x15a   :  { %v176_v38 = vsel %vm169_vm3, %v175_v37, 0.0 }
 0x15b   :  { %177 = vadd.xlane.f32.xlu0 %v176_v38  ;;  %v1890_v38 = vld [vmem:[#allocation10 + $0x10] sm:$0xff] }
 0x1e8   :  { %v178_v39 = vpop.xlane.xlu0 %177 }
 0x1e9   :  { %v179_v40 = vmul.f32 0.03125, %v178_v39  ;;  %v1892_v39 = vld [vmem:[#allocation10 + $0x18] sm:$0xff] }
 0x1eb   :  { %v180_v41 = vadd.f32 1e-05, %v179_v40  ;;  %v1894_v40 = vld [vmem:[#allocation10] sm:$0xff] }
 0x1ed   :  { %1550 = vrsqrt.f32 %v180_v41  ;;  %v412_v41 = vsub.s32 3, %v1792_v5 }
 0x1f7   :  { %v1551_v43 = vpop.eup %1550 }
 0x1f8   :  { %v183_v44 = vmul.f32 %v1551_v43, %v182_v42  ;;  %v1898_v43 = vld [vmem:[#allocation10 + $0x8] sm:$0xff] }
 0x1fa   :  { %186 = vperm.xlu0 %1549, %v183_v44  }
 0x279   :  { %v187_v45 = vpop.permute.xlu0 %186 }
 0x27a   :  { %v189_v46 = vmul.f32 %v187_v45, %v174_v36 }
 0x27c   :  { %v196_v48 = vadd.f32 %v194_v47, %v189_v46 }
 0x27e   :  { %v197_v49 = vmax.f32 %v196_v48, 0.0 }
 0x280   :  { %210 = vst.msk [vmem:[#allocation3 + $0x8] sm:$0xff] %vm209_vm8, %v197_v49  ;;  %202 = vrot.lane.b32.xlu1 %v197_v49, %s1642_s22 }
 0x281   :  { %212 = vst.msk [vmem:[#allocation3 + $0x8] sm:$0xff] %vm211_vm9, %v197_v49 }
 0x284   :  { %213 = vrot.lane.b32.xlu1 %v197_v49, %s1643_s15 }
 0x288   :  { %229 = vperm.xlu1 %1548, %v225_v51   ;;  %v221_v56 = vld [vmem:[#allocation3 + $0x8] sm:$0xff]  ;;  %v423_v51 = vsub.s32 4, %v1792_v5 }
 0x28c   :  { %234 = vperm.xlu1 %1548, %v226_v52  }
 0x2f2   :  { %v203_v53 = vpop.permute.xlu1 %202 }
 0x2f3   :  { %206 = vst.msk [vmem:[#allocation3] sm:$0xff] %vm205_vm11, %v203_v53 }
 0x2f4   :  { %208 = vst.msk [vmem:[#allocation3] sm:$0xff] %vm207_vm12, %v203_v53 }
 0x2f6   :  { %v214_v54 = vpop.permute.xlu1 %213 }
 0x2f7   :  { %217 = vst.msk [vmem:[#allocation3 + $0x10] sm:$0xff] %vm216_vm13, %v214_v54 }
 0x2f8   :  { %219 = vst.msk [vmem:[#allocation3 + $0x10] sm:$0xff] %vm218_vm14, %v214_v54 }
 0x2fb   :  { %v220_v55 = vld [vmem:[#allocation3] sm:$0xff] }
 0x2fc   :  { %v1448_v57 = vpack.c.bf16 %v221_v56, %v220_v55  ;;  %v1913_v55 = vld [vmem:[#allocation10 + $0x38] sm:$0xff]  ;;  %v1915_v56 = vld [vmem:[#allocation10 + $0x20] sm:$0xff] }
 0x2fe   :  { %1449 = vmatprep.subr.bf16.mxu0 %v1448_v57 }
 0x2ff   :  { %1451 = vmatpush3.bf16.msra.mxu0 %v1448_v57  ;;  %v222_v58 = vld [vmem:[#allocation3 + $0x10] sm:$0xff]  ;;  %v434_v57 = vsub.s32 5, %v1792_v5 }
 0x300   :  { %1419 = vmatprep.subr.mxu0 %v222_v58 }
 0x303   :  { %1420 = vmatpush3.msra.mxu0 %v222_v58 }
 0x304   :  { %1422 = vmatmul.mubr.msk.f32.vlgmr.msra.gmra.mrb[0].mxu0 %vm237_vm10, %v224_v59 }
 0x305   :  { %1445 = vmatprep.mubr.msk.f32.mxu0 %vm1647_vm15, %v1638_v7 }
 0x307   :  { %v230_v60 = vpop.permute.xlu1 %229 }
 0x30b   :  { %v235_v61 = vpop.permute.xlu1 %234 }
 0x3d7   :  { %v1423_v62 = vpop.f32.mrb[0].mxu0 }
 0x3d8   :  { %v316_v63 = vadd.f32 %v1423_v62, %v235_v61  ;;  %v310_v0 = vpop.f32.mrb[1].mxu0 }
 0x3d9   :  { %v311_v1 = vadd.f32 %v310_v0, %v230_v60 }
 0x3da   :  { %v322_v2 = vsel %vm169_vm3, %v316_v63, 0.0 }
 0x3db   :  { %323 = vadd.xlane.f32.xlu0 %v322_v2  ;;  %v319_v3 = vsel %vm169_vm3, %v311_v1, 0.0  ;;  %v1925_v2 = vld [vmem:[#allocation10 + $0x48] sm:$0xff] }
 0x3dc   :  { %320 = vadd.xlane.f32.xlu1 %v319_v3 }
 0x468   :  { %v324_v4 = vpop.xlane.xlu0 %323 }
 0x469   :  { %v326_v6 = vmul.f32 0.03125, %v324_v4  ;;  %v321_v9 = vpop.xlane.xlu1 %320  ;;  %v1927_v4 = vld [vmem:[#allocation10 + $0x30] sm:$0xff] }
 0x46a   :  { %v325_v10 = vmul.f32 0.03125, %v321_v9  ;;  %v456_v9 = vsub.s32 7, %v1792_v5 }
 0x46b   :  { %v328_v11 = vsub.f32 %v316_v63, %v326_v6 }
 0x46c   :  { %v327_v12 = vsub.f32 %v311_v1, %v325_v10  ;;  %v445_v10 = vsub.s32 6, %v1792_v5 }
 0x46d   :  { %v330_v15 = vmul.f32 %v328_v11, %v328_v11 }
 0x46e   :  { %v329_v13 = vmul.f32 %v327_v12, %v327_v12 }
 0x46f   :  { %v334_v17 = vsel %vm169_vm3, %v330_v15, 0.0  ;;  %v1935_v15 = vld [vmem:[#allocation10 + $0x58] sm:$0xff] }
 0x470   :  { %v331_v14 = vsel %vm169_vm3, %v329_v13, 0.0 }
 0x471   :  { %332 = vadd.xlane.f32.xlu1 %v331_v14 }
 0x475   :  { %335 = vadd.xlane.f32.xlu1 %v334_v17 }
 0x486   :  { %363 = vperm.xlu1 %1548, %v359_v18   ;;  %v1937_v18 = vld [vmem:[#allocation10 + $0x40] sm:$0xff] }
 0x4fe   :  { %v333_v19 = vpop.xlane.xlu1 %332 }
 0x4ff   :  { %v337_v20 = vmul.f32 0.03125, %v333_v19 }
 0x501   :  { %v339_v21 = vadd.f32 1e-05, %v337_v20 }
 0x502   :  { %v336_v23 = vpop.xlane.xlu1 %335 }
 0x503   :  { %1552 = vrsqrt.f32 %v339_v21  ;;  %v338_v24 = vmul.f32 0.03125, %v336_v23 }
 0x505   :  { %v340_v25 = vadd.f32 1e-05, %v338_v24 }
 0x506   :  { %v364_v35 = vpop.permute.xlu1 %363 }
 0x507   :  { %1554 = vrsqrt.f32 %v340_v25 }
 0x50d   :  { %v1553_v27 = vpop.eup %1552 }
 0x50e   :  { %v345_v28 = vmul.f32 %v1553_v27, %v343_v26  ;;  %v1943_v26 = vld [vmem:[#allocation10 + $0x68] sm:$0xff]  ;;  %v1945_v27 = vld [vmem:[#allocation10 + $0x50] sm:$0xff] }
 0x510   :  { %349 = vperm.xlu0 %1549, %v345_v28  }
 0x511   :  { %v1555_v30 = vpop.eup %1554 }
 0x512   :  { %v346_v32 = vmul.f32 %v1555_v30, %v344_v29 }
 0x514   :  { %368 = vperm.xlu0 %1549, %v360_v31   ;;  %354 = vperm.xlu1 %1548, %v346_v32  }
 0x58f   :  { %v350_v33 = vpop.permute.xlu0 %349 }
 0x590   :  { %v357_v34 = vmul.f32 %v350_v33, %v327_v12 }
 0x592   :  { %v371_v36 = vadd.f32 %v364_v35, %v357_v34  ;;  %v1953_v34 = vld [vmem:[#allocation10 + $0x78] sm:$0xff]  ;;  %v1955_v35 = vld [vmem:[#allocation10 + $0x60] sm:$0xff] }
 0x593   :  { %v355_v45 = vpop.permute.xlu1 %354  ;;  %v369_v62 = vpop.permute.xlu0 %368 }
 0x594   :  { %v373_v37 = vmax.f32 %v371_v36, 0.0  ;;  %v358_v54 = vmul.f32 %v355_v45, %v328_v11 }
 0x596   :  { %v391_v42 = vrot.slane %v373_v37, %v1836_v16  ;;  %v380_v44 = vrot.slane %v373_v37, %v1796_v8  ;;  %v402_v46 = vrot.slane %v373_v37, %v1841_v22  ;;  %v413_v53 = vrot.slane %v373_v37, %v412_v41 }
 0x597   :  { %v424_v61 = vrot.slane %v373_v37, %v423_v51  ;;  %v372_v3 = vadd.f32 %v369_v62, %v358_v54  ;;  %v435_v6 = vrot.slane %v373_v37, %v434_v57  ;;  %v457_v20 = vrot.slane %v373_v37, %v456_v9  ;;  %v1974_v54 = vld [vmem:[#allocation10 + $0x98] sm:$0xff]  ;;  %v1982_v62 = vld [vmem:[#allocation10 + $0xa8] sm:$0xff] }
 0x598   :  { %752 = vrot.lane.b32.xlu0 %v391_v42, %s1644_s7  ;;  %v392_v47 = vmul.f32 %v391_v42, %v1890_v38  ;;  %v393_v48 = vmul.f32 %v391_v42, %v1892_v39  ;;  %742 = vrot.lane.b32.xlu1 %v380_v44, %s1644_s7  ;;  %v381_v49 = vmul.f32 %v380_v44, %v1894_v40 }
 0x599   :  { %v382_v52 = vmul.f32 %v380_v44, %v1898_v43  ;;  %v404_v60 = vmul.f32 %v402_v46, %v1907_v50  ;;  %v415_v63 = vmul.f32 %v413_v53, %v1913_v55  ;;  %v403_v0 = vmul.f32 %v402_v46, %v1915_v56 }
 0x59a   :  { %v394_v58 = vadd.f32 %v392_v47, %v381_v49  ;;  %v426_v13 = vmul.f32 %v424_v61, %v1925_v2  ;;  %v414_v14 = vmul.f32 %v413_v53, %v1927_v4  ;;  %v374_v17 = vmax.f32 %v372_v3, 0.0  ;;  %v1966_v47 = vld [vmem:[#allocation10 + $0x70] sm:$0xff] }
 0x59b   :  { %v395_v59 = vadd.f32 %v393_v48, %v382_v52  ;;  %v446_v21 = vrot.slane %v373_v37, %v445_v10  ;;  %v437_v24 = vmul.f32 %v435_v6, %v1935_v15  ;;  %v425_v25 = vmul.f32 %v424_v61, %v1937_v18 }
 0x59c   :  { %772 = vrot.lane.b32.xlu0 %v413_v53, %s1644_s7  ;;  %762 = vrot.lane.b32.xlu1 %v402_v46, %s1644_s7  ;;  %v405_v11 = vadd.f32 %v403_v0, %v394_v58  ;;  %v479_v29 = vrot.slane %v374_v17, %v1836_v16  ;;  %v468_v30 = vrot.slane %v374_v17, %v1796_v8  ;;  %v1964_v46 = vld [vmem:[#allocation10 + $0x88] sm:$0xff]  ;;  %v1976_v58 = vld [vmem:[#allocation10 + $0x80] sm:$0xff] }
 0x59d   :  { %v406_v1 = vadd.f32 %v404_v60, %v395_v59  ;;  %v448_v32 = vmul.f32 %v446_v21, %v1943_v26  ;;  %v436_v33 = vmul.f32 %v435_v6, %v1945_v27  ;;  %v501_v37 = vrot.slane %v374_v17, %v412_v41 }
 0x59e   :  { %v416_v23 = vadd.f32 %v414_v14, %v405_v11  ;;  %v490_v16 = vrot.slane %v374_v17, %v1841_v22  ;;  %v459_v44 = vmul.f32 %v457_v20, %v1953_v34  ;;  %v447_v45 = vmul.f32 %v446_v21, %v1955_v35 }
 0x59f   :  { %v417_v12 = vadd.f32 %v415_v63, %v406_v1  ;;  %v523_v49 = vrot.slane %v374_v17, %v434_v57  ;;  %v512_v41 = vrot.slane %v374_v17, %v423_v51  ;;  %v470_v22 = vmul.f32 %v468_v30, %v1964_v46  ;;  %v1984_v63 = vld [vmem:[#allocation10 + $0x90] sm:$0xff] }
 0x5a0   :  { %792 = vrot.lane.b32.xlu0 %v435_v6, %s1644_s7  ;;  %782 = vrot.lane.b32.xlu1 %v424_v61, %s1644_s7  ;;  %v427_v31 = vadd.f32 %v425_v25, %v416_v23  ;;  %v458_v53 = vmul.f32 %v457_v20, %v1966_v47  ;;  %v545_v60 = vrot.slane %v374_v17, %v456_v9  ;;  %v1988_v9 = vld [vmem:[#allocation10 + $0xb8] sm:$0xff] }
 0x5a1   :  { %v428_v19 = vadd.f32 %v426_v13, %v417_v12  ;;  %v534_v61 = vrot.slane %v374_v17, %v445_v10  ;;  %v481_v5 = vmul.f32 %v479_v29, %v1974_v54  ;;  %v469_v51 = vmul.f32 %v468_v30, %v1976_v58  ;;  %v1990_v10 = vld [vmem:[#allocation10 + $0xa0] sm:$0xff]  ;;  %v1994_v17 = vld [vmem:[#allocation10 + $0xc8] sm:$0xff]  ;;  %v2000_v25 = vld [vmem:[#allocation10 + $0xd8] sm:$0xff] }
 0x5a2   :  { %v438_v42 = vadd.f32 %v436_v33, %v427_v31  ;;  %v492_v3 = vmul.f32 %v490_v16, %v1982_v62  ;;  %v480_v6 = vmul.f32 %v479_v29, %v1984_v63  ;;  %v503_v13 = vmul.f32 %v501_v37, %v1988_v9  ;;  %v2006_v33 = vld [vmem:[#allocation10 + $0xe8] sm:$0xff] }
 0x5a3   :  { %v439_v28 = vadd.f32 %v437_v24, %v428_v19  ;;  %v491_v14 = vmul.f32 %v490_v16, %v1990_v10  ;;  %v1996_v19 = vld [vmem:[#allocation10 + $0xb0] sm:$0xff]  ;;  %v514_v23 = vmul.f32 %v512_v41, %v1994_v17  ;;  %v525_v31 = vmul.f32 %v523_v49, %v2000_v25 }
 0x5a4   :  { %812 = vrot.lane.b32.xlu0 %v457_v20, %s1644_s7  ;;  %802 = vrot.lane.b32.xlu1 %v446_v21, %s1644_s7  ;;  %v449_v52 = vadd.f32 %v447_v45, %v438_v42  ;;  %v502_v24 = vmul.f32 %v501_v37, %v1996_v19  ;;  %v2011_v45 = vld [vmem:[#allocation10 + $0xf8] sm:$0xff] }
 0x5a5   :  { %v450_v36 = vadd.f32 %v448_v32, %v439_v28  ;;  %v2002_v28 = vld [vmem:[#allocation10 + $0xc0] sm:$0xff] }
 0x5a6   :  { %v460_v57 = vadd.f32 %v458_v53, %v449_v52  ;;  %v513_v32 = vmul.f32 %v512_v41, %v2002_v28  ;;  %v2014_v52 = vld [vmem:[#allocation10 + $0xe0] sm:$0xff]  ;;  %v547_v53 = vmul.f32 %v545_v60, %v2011_v45 }
 0x5a7   :  { %v461_v48 = vadd.f32 %v459_v44, %v450_v36  ;;  %v536_v44 = vmul.f32 %v534_v61, %v2006_v33 }
 0x5a8   :  { %832 = vrot.lane.b32.xlu0 %v479_v29, %s1644_s7  ;;  %822 = vrot.lane.b32.xlu1 %v468_v30, %s1644_s7  ;;  %v471_v1 = vadd.f32 %v469_v51, %v460_v57  ;;  %v2018_v57 = vld [vmem:[#allocation10 + $0xf0] sm:$0xff] }
 0x5a9   :  { %v472_v59 = vadd.f32 %v470_v22, %v461_v48  ;;  %v546_v51 = vmul.f32 %v545_v60, %v2018_v57 }
 0x5aa   :  { %v482_v12 = vadd.f32 %v480_v6, %v471_v1 }
 0x5ab   :  { %v483_v0 = vadd.f32 %v481_v5, %v472_v59 }
 0x5ac   :  { %852 = vrot.lane.b32.xlu0 %v501_v37, %s1644_s7  ;;  %842 = vrot.lane.b32.xlu1 %v490_v16, %s1644_s7  ;;  %v493_v21 = vadd.f32 %v491_v14, %v482_v12  ;;  %v2008_v16 = vld [vmem:[#allocation10 + $0xd0] sm:$0xff] }
 0x5ad   :  { %v494_v11 = vadd.f32 %v492_v3, %v483_v0  ;;  %v524_v37 = vmul.f32 %v523_v49, %v2008_v16 }
 0x5ae   :  { %v504_v30 = vadd.f32 %v502_v24, %v493_v21 }
 0x5af   :  { %v505_v20 = vadd.f32 %v503_v13, %v494_v11 }
 0x5b0   :  { %872 = vrot.lane.b32.xlu0 %v523_v49, %s1644_s7  ;;  %862 = vrot.lane.b32.xlu1 %v512_v41, %s1644_s7  ;;  %v515_v42 = vadd.f32 %v513_v32, %v504_v30  ;;  %v535_v41 = vmul.f32 %v534_v61, %v2014_v52 }
 0x5b1   :  { %v516_v29 = vadd.f32 %v514_v23, %v505_v20 }
 0x5b2   :  { %v526_v22 = vadd.f32 %v524_v37, %v515_v42 }
 0x5b3   :  { %v527_v36 = vadd.f32 %v525_v31, %v516_v29 }
 0x5b4   :  { %892 = vrot.lane.b32.xlu0 %v545_v60, %s1644_s7  ;;  %882 = vrot.lane.b32.xlu1 %v534_v61, %s1644_s7  ;;  %v537_v5 = vadd.f32 %v535_v41, %v526_v22 }
 0x5b5   :  { %v538_v48 = vadd.f32 %v536_v44, %v527_v36 }
 0x5b6   :  { %v548_v1 = vadd.f32 %v546_v51, %v537_v5 }
 0x5b7   :  { %v549_v59 = vadd.f32 %v547_v53, %v538_v48 }
 0x5b8   :  { %v550_v49 = vsel %vm209_vm8, %v548_v1, 0.0 }
 0x5b9   :  { %v553_v0 = vsel %vm209_vm8, %v549_v59, 0.0 }
 0x5d3   :  { %554 = vadd.xlane.f32.xlu0 %v553_v0 }
 0x5d8   :  { %551 = vadd.xlane.f32.xlu1 %v550_v49 }
 0x60a   :  { %v753_v3 = vpop.permute.xlu0 %752  ;;  %v743_v6 = vpop.permute.xlu1 %742 }
 0x60b   :  { %v755_v11 = vmul.f32 %v753_v3, %v1890_v38  ;;  %v756_v12 = vmul.f32 %v753_v3, %v1892_v39  ;;  %v745_v61 = vmul.f32 %v743_v6, %v1894_v40  ;;  %v746_v13 = vmul.f32 %v743_v6, %v1898_v43 }
 0x60d   :  { %v757_v60 = vadd.f32 %v755_v11, %v745_v61  ;;  %v758_v21 = vadd.f32 %v756_v12, %v746_v13 }
 0x60e   :  { %v773_v14 = vpop.permute.xlu0 %772  ;;  %v763_v20 = vpop.permute.xlu1 %762 }
 0x60f   :  { %v765_v23 = vmul.f32 %v763_v20, %v1915_v56  ;;  %v766_v24 = vmul.f32 %v763_v20, %v1907_v50  ;;  %v775_v29 = vmul.f32 %v773_v14, %v1927_v4  ;;  %v776_v30 = vmul.f32 %v773_v14, %v1913_v55 }
 0x611   :  { %v767_v31 = vadd.f32 %v765_v23, %v757_v60  ;;  %v768_v38 = vadd.f32 %v766_v24, %v758_v21 }
 0x612   :  { %v793_v32 = vpop.permute.xlu0 %792  ;;  %v783_v39 = vpop.permute.xlu1 %782 }
 0x613   :  { %v777_v36 = vadd.f32 %v775_v29, %v767_v31  ;;  %v778_v40 = vadd.f32 %v776_v30, %v768_v38  ;;  %v785_v43 = vmul.f32 %v783_v39, %v1937_v18  ;;  %v786_v42 = vmul.f32 %v783_v39, %v1925_v2 }
 0x614   :  { %v795_v44 = vmul.f32 %v793_v32, %v1945_v27  ;;  %v796_v56 = vmul.f32 %v793_v32, %v1935_v15 }
 0x615   :  { %v787_v37 = vadd.f32 %v785_v43, %v777_v36  ;;  %v788_v50 = vadd.f32 %v786_v42, %v778_v40 }
 0x616   :  { %v813_v48 = vpop.permute.xlu0 %812  ;;  %v803_v4 = vpop.permute.xlu1 %802 }
 0x617   :  { %v805_v55 = vmul.f32 %v803_v4, %v1955_v35  ;;  %v806_v22 = vmul.f32 %v803_v4, %v1943_v26  ;;  %v797_v53 = vadd.f32 %v795_v44, %v787_v37  ;;  %v798_v41 = vadd.f32 %v796_v56, %v788_v50  ;;  %v2066_v37 = vld [vmem:[%s2292_s18 + $0x8] sm:$0xff] }
 0x618   :  { %v815_v59 = vmul.f32 %v813_v48, %v1966_v47  ;;  %v816_v18 = vmul.f32 %v813_v48, %v1953_v34 }
 0x619   :  { %v807_v5 = vadd.f32 %v805_v55, %v797_v53  ;;  %v808_v2 = vadd.f32 %v806_v22, %v798_v41 }
 0x61a   :  { %v833_v51 = vpop.permute.xlu0 %832  ;;  %v823_v27 = vpop.permute.xlu1 %822 }
 0x61b   :  { %v825_v15 = vmul.f32 %v823_v27, %v1976_v58  ;;  %v826_v0 = vmul.f32 %v823_v27, %v1964_v46  ;;  %v817_v1 = vadd.f32 %v815_v59, %v807_v5  ;;  %v818_v49 = vadd.f32 %v816_v18, %v808_v2 }
 0x61c   :  { %v835_v35 = vmul.f32 %v833_v51, %v1984_v63  ;;  %v836_v26 = vmul.f32 %v833_v51, %v1974_v54 }
 0x61d   :  { %v827_v3 = vadd.f32 %v825_v15, %v817_v1  ;;  %v828_v6 = vadd.f32 %v826_v0, %v818_v49  ;;  %v2069_v15 = vld [vmem:[#allocation13] sm:$0xff]  ;;  %v2071_v0 = vld [vmem:[#allocation13 + $0x8] sm:$0xff]  ;;  %v2081_v49 = vld [vmem:[%s2294_s20 + $0x8] sm:$0xff] }
 0x61e   :  { %v853_v11 = vpop.permute.xlu0 %852  ;;  %v843_v47 = vpop.permute.xlu1 %842  ;;  %v2076_v1 = vld [vmem:[%s2294_s20] sm:$0xff] }
 0x61f   :  { %v845_v34 = vmul.f32 %v843_v47, %v1990_v10  ;;  %v846_v12 = vmul.f32 %v843_v47, %v1982_v62  ;;  %v837_v61 = vadd.f32 %v835_v35, %v827_v3  ;;  %v838_v13 = vadd.f32 %v836_v26, %v828_v6  ;;  %v2083_v26 = vld [vmem:[#allocation13 + $0x10] sm:$0xff]  ;;  %v2085_v3 = vld [vmem:[#allocation13 + $0x18] sm:$0xff] }
 0x620   :  { %v855_v58 = vmul.f32 %v853_v11, %v1996_v19  ;;  %v856_v46 = vmul.f32 %v853_v11, %v1988_v9 }
 0x621   :  { %v847_v14 = vadd.f32 %v845_v34, %v837_v61  ;;  %v848_v20 = vadd.f32 %v846_v12, %v838_v13  ;;  %v2089_v34 = vld [vmem:[#allocation13 + $0x20] sm:$0xff]  ;;  %v2091_v12 = vld [vmem:[#allocation13 + $0x28] sm:$0xff] }
 0x622   :  { %v873_v60 = vpop.permute.xlu0 %872  ;;  %v863_v63 = vpop.permute.xlu1 %862 }
 0x623   :  { %v865_v54 = vmul.f32 %v863_v63, %v2002_v28  ;;  %v866_v21 = vmul.f32 %v863_v63, %v1994_v17  ;;  %v857_v23 = vadd.f32 %v855_v58, %v847_v14  ;;  %v858_v24 = vadd.f32 %v856_v46, %v848_v20  ;;  %v2097_v20 = vld [vmem:[#allocation13 + $0x30] sm:$0xff] }
 0x624   :  { %v875_v10 = vmul.f32 %v873_v60, %v2008_v16  ;;  %v876_v62 = vmul.f32 %v873_v60, %v2000_v25  ;;  %v2099_v60 = vld [vmem:[#allocation13 + $0x38] sm:$0xff] }
 0x625   :  { %v867_v29 = vadd.f32 %v865_v54, %v857_v23  ;;  %v868_v30 = vadd.f32 %v866_v21, %v858_v24 }
 0x626   :  { %v883_v31 = vpop.permute.xlu1 %882  ;;  %v893_v19 = vpop.permute.xlu0 %892 }
 0x627   :  { %v885_v9 = vmul.f32 %v883_v31, %v2014_v52  ;;  %v886_v38 = vmul.f32 %v883_v31, %v2006_v33  ;;  %v877_v32 = vadd.f32 %v875_v10, %v867_v29  ;;  %v878_v39 = vadd.f32 %v876_v62, %v868_v30  ;;  %v2060_v33 = vld [vmem:[%s2292_s18] sm:$0xff]  ;;  %v2103_v10 = vld [vmem:[#allocation13 + $0x40] sm:$0xff] }
 0x628   :  { %v895_v28 = vmul.f32 %v893_v19, %v2018_v57  ;;  %v896_v17 = vmul.f32 %v893_v19, %v2011_v45  ;;  %v2105_v62 = vld [vmem:[#allocation13 + $0x48] sm:$0xff] }
 0x629   :  { %v887_v36 = vadd.f32 %v885_v9, %v877_v32  ;;  %v888_v40 = vadd.f32 %v886_v38, %v878_v39  ;;  %v2109_v38 = vld [vmem:[#allocation13 + $0x50] sm:$0xff]  ;;  %v2111_v32 = vld [vmem:[#allocation13 + $0x58] sm:$0xff] }
 0x62b   :  { %v898_v43 = vadd.f32 %v896_v17, %v888_v40  ;;  %v897_v16 = vadd.f32 %v895_v28, %v887_v36 }
 0x62d   :  { %v902_v25 = vsel %vm209_vm8, %v898_v43, 0.0  ;;  %v899_v42 = vsel %vm209_vm8, %v897_v16, 0.0  ;;  %v2115_v43 = vld [vmem:[#allocation13 + $0x60] sm:$0xff]  ;;  %v2117_v16 = vld [vmem:[#allocation13 + $0x68] sm:$0xff] }
 0x62e   :  { %903 = vadd.xlane.f32.xlu1 %v902_v25  ;;  %900 = vadd.xlane.f32.xlu0 %v899_v42 }
 0x660   :  { %v555_v50 = vpop.xlane.xlu0 %554 }
 0x661   :  { %v559_v22 = vadd.f32 %v2066_v37, %v555_v50 }
 0x663   :  { %v663_v41 = vrot.slane %v559_v22, 1  ;;  %v674_v59 = vrot.slane %v559_v22, 2  ;;  %v685_v18 = vrot.slane %v559_v22, 3  ;;  %v696_v5 = vrot.slane %v559_v22, 4 }
 0x664   :  { %v707_v2 = vrot.slane %v559_v22, 5  ;;  %v718_v51 = vrot.slane %v559_v22, 6  ;;  %v729_v27 = vrot.slane %v559_v22, 7 }
 0x665   :  { %v552_v52 = vpop.xlane.xlu1 %551 }
 0x666   :  { %v558_v57 = vadd.f32 %v2060_v33, %v552_v52 }
 0x668   :  { %1464 = vpush %v558_v57  ;;  %v575_v45 = vrot.slane %v558_v57, 1  ;;  %v586_v44 = vrot.slane %v558_v57, 2  ;;  %v597_v56 = vrot.slane %v558_v57, 3  ;;  %v608_v48 = vrot.slane %v558_v57, 4 }
 0x669   :  { %v619_v4 = vrot.slane %v558_v57, 5  ;;  %v630_v55 = vrot.slane %v558_v57, 6  ;;  %v641_v53 = vrot.slane %v558_v57, 7 }
 0x66a   :  { %1466 = vpush %v575_v45 }
 0x66b   :  { %1468 = vpush %v586_v44  ;;  %v2121_v44 = vld [vmem:[#allocation13 + $0x70] sm:$0xff] }
 0x66c   :  { %1470 = vpush %v597_v56  ;;  %v2123_v56 = vld [vmem:[#allocation13 + $0x78] sm:$0xff] }
 0x66d   :  { %1472 = vpush %v608_v48 }
 0x66e   :  { %1474 = vpush %v619_v4 }
 0x66f   :  { %1476 = vpush %v630_v55 }
 0x670   :  { %1478 = vpush %v641_v53  ;;  %v2127_v53 = vld [vmem:[#allocation13 + $0x80] sm:$0xff] }
 0x671   :  { %1480 = vpush %v559_v22 }
 0x672   :  { %1482 = vpush %v663_v41  ;;  %v2129_v41 = vld [vmem:[#allocation13 + $0x88] sm:$0xff] }
 0x673   :  { %1484 = vpush %v674_v59 }
 0x674   :  { %1486 = vpush %v685_v18 }
 0x675   :  { %1488 = vpush %v696_v5 }
 0x676   :  { %1490 = vpush %v707_v2 }
 0x677   :  { %1492 = vpush %v718_v51 }
 0x678   :  { %1494 = vpush %v729_v27  ;;  %v2133_v27 = vld [vmem:[#allocation13 + $0x90] sm:$0xff] }
 0x699   :  { %s1465_s16 = spop %1464 }
 0x69a   :  { %v566_v35 = vstv %s1465_s16 }
 0x69b   :  { %v568_v6 = vmul.f32 %v566_v35, %v2069_v15  ;;  %v569_v11 = vmul.f32 %v566_v35, %v2071_v0  ;;  %s1467_s6 = spop %1466  ;;  %v2135_v35 = vld [vmem:[#allocation13 + $0x98] sm:$0xff] }
 0x69c   :  { %v577_v47 = vstv %s1467_s6  ;;  %s1469_s26 = spop %1468 }
 0x69d   :  { %v570_v61 = vadd.f32 %v568_v6, %v2076_v1  ;;  %v571_v13 = vadd.f32 %v569_v11, %v2081_v49  ;;  %v579_v58 = vmul.f32 %v577_v47, %v2083_v26  ;;  %v580_v46 = vmul.f32 %v577_v47, %v2085_v3  ;;  %s1471_s20 = spop %1470 }
 0x69e   :  { %v588_v14 = vstv %s1469_s26  ;;  %v599_v63 = vstv %s1471_s20  ;;  %s1473_s27 = spop %1472 }
 0x69f   :  { %v581_v54 = vadd.f32 %v579_v58, %v570_v61  ;;  %v582_v21 = vadd.f32 %v580_v46, %v571_v13  ;;  %v590_v23 = vmul.f32 %v588_v14, %v2089_v34  ;;  %v591_v24 = vmul.f32 %v588_v14, %v2091_v12  ;;  %s1475_s3 = spop %1474  ;;  %v2139_v58 = vld [vmem:[#allocation13 + $0xa0] sm:$0xff]  ;;  %v2141_v46 = vld [vmem:[#allocation13 + $0xa8] sm:$0xff] }
 0x6a0   :  { %v610_v29 = vstv %s1473_s27  ;;  %v601_v19 = vmul.f32 %v599_v63, %v2097_v20  ;;  %v602_v9 = vmul.f32 %v599_v63, %v2099_v60  ;;  %s1477_s28 = spop %1476  ;;  %v621_v39 = vstv %s1475_s3 }
 0x6a1   :  { %v592_v30 = vadd.f32 %v590_v23, %v581_v54  ;;  %v593_v31 = vadd.f32 %v591_v24, %v582_v21  ;;  %v612_v36 = vmul.f32 %v610_v29, %v2103_v10  ;;  %v613_v40 = vmul.f32 %v610_v29, %v2105_v62  ;;  %s1479_s29 = spop %1478  ;;  %v2145_v24 = vld [vmem:[#allocation13 + $0xb0] sm:$0xff]  ;;  %v2147_v29 = vld [vmem:[#allocation13 + $0xb8] sm:$0xff] }
 0x6a2   :  { %v632_v25 = vstv %s1477_s28  ;;  %v623_v57 = vmul.f32 %v621_v39, %v2109_v38  ;;  %v624_v45 = vmul.f32 %v621_v39, %v2111_v32  ;;  %s1481_s4 = spop %1480  ;;  %v643_v50 = vstv %s1479_s29 }
 0x6a3   :  { %v603_v28 = vadd.f32 %v601_v19, %v592_v30  ;;  %v604_v17 = vadd.f32 %v602_v9, %v593_v31  ;;  %v634_v55 = vmul.f32 %v632_v25, %v2115_v43  ;;  %v635_v22 = vmul.f32 %v632_v25, %v2117_v16  ;;  %s1483_s30 = spop %1482 }
 0x6a4   :  { %v654_v59 = vstv %s1481_s4  ;;  %v645_v2 = vmul.f32 %v643_v50, %v2121_v44  ;;  %v646_v51 = vmul.f32 %v643_v50, %v2123_v56  ;;  %s1485_s14 = spop %1484  ;;  %v665_v6 = vstv %s1483_s30 }
 0x6a5   :  { %v614_v42 = vadd.f32 %v612_v36, %v603_v28  ;;  %v615_v52 = vadd.f32 %v613_v40, %v604_v17  ;;  %v656_v61 = vmul.f32 %v654_v59, %v2127_v53  ;;  %v657_v13 = vmul.f32 %v654_v59, %v2129_v41  ;;  %s1487_s5 = spop %1486  ;;  %v2151_v28 = vld [vmem:[#allocation13 + $0xc0] sm:$0xff]  ;;  %v2153_v17 = vld [vmem:[#allocation13 + $0xc8] sm:$0xff] }
 0x6a6   :  { %v676_v14 = vstv %s1485_s14  ;;  %v667_v21 = vmul.f32 %v665_v6, %v2133_v27  ;;  %v668_v23 = vmul.f32 %v665_v6, %v2135_v35  ;;  %s1489_s8 = spop %1488  ;;  %v687_v30 = vstv %s1487_s5  ;;  %v2163_v59 = vld [vmem:[#allocation13 + $0xe0] sm:$0xff] }
 0x6a7   :  { %v625_v48 = vadd.f32 %v623_v57, %v614_v42  ;;  %v626_v4 = vadd.f32 %v624_v45, %v615_v52  ;;  %v678_v9 = vmul.f32 %v676_v14, %v2139_v58  ;;  %v679_v39 = vmul.f32 %v676_v14, %v2141_v46  ;;  %s1491_s17 = spop %1490  ;;  %v2157_v57 = vld [vmem:[#allocation13 + $0xd0] sm:$0xff]  ;;  %v2159_v45 = vld [vmem:[#allocation13 + $0xd8] sm:$0xff] }
 0x6a8   :  { %v698_v36 = vstv %s1489_s8  ;;  %v689_v42 = vmul.f32 %v687_v30, %v2145_v24  ;;  %v690_v52 = vmul.f32 %v687_v30, %v2147_v29  ;;  %s1493_s0 = spop %1492  ;;  %v709_v50 = vstv %s1491_s17  ;;  %s1645_s8 = smov 16  }
 0x6a9   :  { %v636_v18 = vadd.f32 %v634_v55, %v625_v48  ;;  %v637_v5 = vadd.f32 %v635_v22, %v626_v4  ;;  %v700_v55 = vmul.f32 %v698_v36, %v2151_v28  ;;  %v701_v22 = vmul.f32 %v698_v36, %v2153_v17  ;;  %s1495_s19 = spop %1494 }
 0x6aa   :  { %v711_v6 = vmul.f32 %v709_v50, %v2157_v57 }
 0x6ab   :  { %v647_v11 = vadd.f32 %v645_v2, %v636_v18  ;;  %v648_v47 = vadd.f32 %v646_v51, %v637_v5  ;;  %v2165_v18 = vld [vmem:[#allocation13 + $0xe8] sm:$0xff]  ;;  %v720_v5 = vstv %s1493_s0 }
 0x6ad   :  { %v658_v63 = vadd.f32 %v656_v61, %v647_v11  ;;  %v659_v54 = vadd.f32 %v657_v13, %v648_v47  ;;  %v712_v11 = vmul.f32 %v709_v50, %v2159_v45  ;;  %v2169_v47 = vld [vmem:[#allocation13 + $0xf0] sm:$0xff]  ;;  %v2171_v61 = vld [vmem:[#allocation13 + $0xf8] sm:$0xff]  ;;  %v731_v13 = vstv %s1495_s19 }
 0x6af   :  { %v669_v31 = vadd.f32 %v667_v21, %v658_v63  ;;  %v670_v19 = vadd.f32 %v668_v23, %v659_v54  ;;  %v722_v54 = vmul.f32 %v720_v5, %v2163_v59  ;;  %v723_v21 = vmul.f32 %v720_v5, %v2165_v18 }
 0x6b1   :  { %v680_v40 = vadd.f32 %v678_v9, %v669_v31  ;;  %v681_v25 = vadd.f32 %v679_v39, %v670_v19  ;;  %v733_v31 = vmul.f32 %v731_v13, %v2169_v47  ;;  %v734_v19 = vmul.f32 %v731_v13, %v2171_v61 }
 0x6b3   :  { %v691_v48 = vadd.f32 %v689_v42, %v680_v40  ;;  %v692_v4 = vadd.f32 %v690_v52, %v681_v25 }
 0x6b5   :  { %v702_v2 = vadd.f32 %v700_v55, %v691_v48  ;;  %v703_v51 = vadd.f32 %v701_v22, %v692_v4 }
 0x6b7   :  { %v713_v14 = vadd.f32 %v711_v6, %v702_v2  ;;  %v714_v63 = vadd.f32 %v712_v11, %v703_v51 }
 0x6b9   :  { %v724_v23 = vadd.f32 %v722_v54, %v713_v14  ;;  %v725_v30 = vadd.f32 %v723_v21, %v714_v63 }
 0x6bb   :  { %v735_v9 = vadd.f32 %v733_v31, %v724_v23  ;;  %v736_v39 = vadd.f32 %v734_v19, %v725_v30  ;;  %v901_v36 = vpop.xlane.xlu0 %900  ;;  %v904_v25 = vpop.xlane.xlu1 %903 }
 0x6bc   :  { %v907_v40 = vadd.f32 %v901_v36, %v2060_v33  ;;  %v908_v4 = vadd.f32 %v904_v25, %v2066_v37 }
 0x6bd   :  { %737 = vst.msk [vmem:[#allocation6] sm:$0xff] %vm209_vm8, %v735_v9  ;;  %738 = vst.msk [vmem:[#allocation6 + $0x8] sm:$0xff] %vm209_vm8, %v736_v39 }
 0x6be   :  { %1496 = vpush %v907_v40  ;;  %v923_v42 = vrot.slane %v907_v40, 1  ;;  %v933_v52 = vrot.slane %v907_v40, 2  ;;  %v943_v50 = vrot.slane %v907_v40, 3  ;;  %v953_v48 = vrot.slane %v907_v40, 4 }
 0x6bf   :  { %v963_v55 = vrot.slane %v907_v40, 5  ;;  %v973_v22 = vrot.slane %v907_v40, 6  ;;  %v983_v5 = vrot.slane %v907_v40, 7  ;;  %v1003_v2 = vrot.slane %v908_v4, 1 }
 0x6c0   :  { %1498 = vpush %v923_v42  ;;  %v1013_v51 = vrot.slane %v908_v4, 2  ;;  %v1023_v33 = vrot.slane %v908_v4, 3  ;;  %v1033_v6 = vrot.slane %v908_v4, 4  ;;  %v1043_v11 = vrot.slane %v908_v4, 5 }
 0x6c1   :  { %1500 = vpush %v933_v52  ;;  %v1053_v13 = vrot.slane %v908_v4, 6  ;;  %v1063_v37 = vrot.slane %v908_v4, 7 }
 0x6c2   :  { %1502 = vpush %v943_v50 }
 0x6c3   :  { %1504 = vpush %v953_v48 }
 0x6c4   :  { %1506 = vpush %v963_v55 }
 0x6c5   :  { %1508 = vpush %v973_v22 }
 0x6c6   :  { %1510 = vpush %v983_v5 }
 0x6c7   :  { %1512 = vpush %v908_v4 }
 0x6c8   :  { %1514 = vpush %v1003_v2 }
 0x6c9   :  { %1516 = vpush %v1013_v51 }
 0x6ca   :  { %1518 = vpush %v1023_v33 }
 0x6cb   :  { %1520 = vpush %v1033_v6 }
 0x6cc   :  { %1522 = vpush %v1043_v11 }
 0x6cd   :  { %1524 = vpush %v1053_v13 }
 0x6ce   :  { %1526 = vpush %v1063_v37 }
 0x6ef   :  { %s1497_s18 = spop %1496 }
 0x6f0   :  { %v915_v14 = vstv %s1497_s18 }
 0x6f1   :  { %v917_v63 = vmul.f32 %v915_v14, %v2069_v15  ;;  %v918_v54 = vmul.f32 %v915_v14, %v2071_v0  ;;  %s1499_s23 = spop %1498 }
 0x6f2   :  { %v925_v21 = vstv %s1499_s23  ;;  %s1501_s16 = spop %1500 }
 0x6f3   :  { %v919_v23 = vadd.f32 %v917_v63, %v2076_v1  ;;  %v920_v30 = vadd.f32 %v918_v54, %v2081_v49  ;;  %v927_v31 = vmul.f32 %v925_v21, %v2083_v26  ;;  %v928_v19 = vmul.f32 %v925_v21, %v2085_v3  ;;  %s1503_s1 = spop %1502 }
 0x6f4   :  { %v935_v9 = vstv %s1501_s16  ;;  %v945_v39 = vstv %s1503_s1  ;;  %s1505_s24 = spop %1504 }
 0x6f5   :  { %v929_v36 = vadd.f32 %v927_v31, %v919_v23  ;;  %v930_v40 = vadd.f32 %v928_v19, %v920_v30  ;;  %v937_v15 = vmul.f32 %v935_v9, %v2089_v34  ;;  %v938_v0 = vmul.f32 %v935_v9, %v2091_v12  ;;  %s1507_s6 = spop %1506 }
 0x6f6   :  { %v955_v25 = vstv %s1505_s24  ;;  %v947_v49 = vmul.f32 %v945_v39, %v2097_v20  ;;  %v948_v26 = vmul.f32 %v945_v39, %v2099_v60  ;;  %s1509_s26 = spop %1508  ;;  %v965_v3 = vstv %s1507_s6 }
 0x6f7   :  { %v939_v42 = vadd.f32 %v937_v15, %v929_v36  ;;  %v940_v1 = vadd.f32 %v938_v0, %v930_v40  ;;  %v957_v48 = vmul.f32 %v955_v25, %v2103_v10  ;;  %v958_v4 = vmul.f32 %v955_v25, %v2105_v62  ;;  %s1511_s20 = spop %1510 }
 0x6f8   :  { %v975_v34 = vstv %s1509_s26  ;;  %v967_v22 = vmul.f32 %v965_v3, %v2109_v38  ;;  %v968_v5 = vmul.f32 %v965_v3, %v2111_v32  ;;  %s1513_s27 = spop %1512  ;;  %v985_v20 = vstv %s1511_s20 }
 0x6f9   :  { %v949_v52 = vadd.f32 %v947_v49, %v939_v42  ;;  %v950_v50 = vadd.f32 %v948_v26, %v940_v1  ;;  %v977_v51 = vmul.f32 %v975_v34, %v2115_v43  ;;  %v978_v33 = vmul.f32 %v975_v34, %v2117_v16  ;;  %s1515_s3 = spop %1514 }
 0x6fa   :  { %v995_v10 = vstv %s1513_s27  ;;  %v987_v11 = vmul.f32 %v985_v20, %v2121_v44  ;;  %v988_v13 = vmul.f32 %v985_v20, %v2123_v56  ;;  %s1517_s28 = spop %1516  ;;  %v1005_v38 = vstv %s1515_s3 }
 0x6fb   :  { %v959_v55 = vadd.f32 %v957_v48, %v949_v52  ;;  %v960_v12 = vadd.f32 %v958_v4, %v950_v50  ;;  %v997_v14 = vmul.f32 %v995_v10, %v2127_v53  ;;  %v998_v63 = vmul.f32 %v995_v10, %v2129_v41  ;;  %s1519_s29 = spop %1518 }
 0x6fc   :  { %v1015_v43 = vstv %s1517_s28  ;;  %v1007_v21 = vmul.f32 %v1005_v38, %v2133_v27  ;;  %v1008_v23 = vmul.f32 %v1005_v38, %v2135_v35  ;;  %s1521_s4 = spop %1520  ;;  %v1025_v44 = vstv %s1519_s29 }
 0x6fd   :  { %v969_v2 = vadd.f32 %v967_v22, %v959_v55  ;;  %v970_v60 = vadd.f32 %v968_v5, %v960_v12  ;;  %v1017_v31 = vmul.f32 %v1015_v43, %v2139_v58  ;;  %v1018_v19 = vmul.f32 %v1015_v43, %v2141_v46  ;;  %s1523_s30 = spop %1522 }
 0x6fe   :  { %v1035_v53 = vstv %s1521_s4  ;;  %v1027_v39 = vmul.f32 %v1025_v44, %v2145_v24  ;;  %v1028_v36 = vmul.f32 %v1025_v44, %v2147_v29  ;;  %s1525_s14 = spop %1524  ;;  %v1045_v27 = vstv %s1523_s30 }
 0x6ff   :  { %v979_v6 = vadd.f32 %v977_v51, %v969_v2  ;;  %v980_v62 = vadd.f32 %v978_v33, %v970_v60  ;;  %v1037_v15 = vmul.f32 %v1035_v53, %v2151_v28  ;;  %v1038_v0 = vmul.f32 %v1035_v53, %v2153_v17  ;;  %s1527_s5 = spop %1526 }
 0x700   :  { %v1055_v58 = vstv %s1525_s14  ;;  %v1047_v42 = vmul.f32 %v1045_v27, %v2157_v57  ;;  %v1048_v1 = vmul.f32 %v1045_v27, %v2159_v45  ;;  %v1065_v49 = vstv %s1527_s5 }
 0x701   :  { %v989_v37 = vadd.f32 %v987_v11, %v979_v6  ;;  %v990_v32 = vadd.f32 %v988_v13, %v980_v62  ;;  %v1057_v29 = vmul.f32 %v1055_v58, %v2163_v59  ;;  %v1058_v3 = vmul.f32 %v1055_v58, %v2165_v18  ;;  %v1125_v11 = vld [vmem:[%s2285_s9] sm:$0xff] }
 0x702   :  { %v1067_v28 = vmul.f32 %v1065_v49, %v2169_v47  ;;  %v1068_v17 = vmul.f32 %v1065_v49, %v2171_v61  ;;  %v1646_v59 = vmov 0.0|0.0   ;;  %v1126_v61 = vld [vmem:[%s2286_s10] sm:$0xff] }
 0x703   :  { %v999_v54 = vadd.f32 %v997_v14, %v989_v37  ;;  %v1000_v16 = vadd.f32 %v998_v63, %v990_v32  ;;  %1452 = vmatprep.subr.bf16.mxu1 %v1646_v59  ;;  %1461 = vmatprep.subr.bf16.mxu0 %v1646_v59 }
 0x705   :  { %v1009_v30 = vadd.f32 %v1007_v21, %v999_v54  ;;  %v1010_v56 = vadd.f32 %v1008_v23, %v1000_v16  ;;  %v1226_v23 = vld [vmem:[%s2288_s12] sm:$0xff] }
 0x707   :  { %v1019_v9 = vadd.f32 %v1017_v31, %v1009_v30  ;;  %v1020_v41 = vadd.f32 %v1018_v19, %v1010_v56  ;;  %v1218_v31 = vld [vmem:[%s2287_s11] sm:$0xff] }
 0x709   :  { %v1029_v40 = vadd.f32 %v1027_v39, %v1019_v9  ;;  %v1030_v35 = vadd.f32 %v1028_v36, %v1020_v41 }
 0x70b   :  { %v1039_v25 = vadd.f32 %v1037_v15, %v1029_v40  ;;  %v1040_v46 = vadd.f32 %v1038_v0, %v1030_v35  ;;  %v1254_v40 = vld [vmem:[#allocation7] sm:$0x1] }
 0x70d   :  { %v1049_v24 = vadd.f32 %v1047_v42, %v1039_v25  ;;  %v1050_v26 = vadd.f32 %v1048_v1, %v1040_v46  ;;  %v1253_v46 = vld [vmem:[%s2289_s13] sm:$0x1]  ;;  %s1648_s13 = smov [#allocation15]  }
 0x70f   :  { %v1059_v52 = vadd.f32 %v1057_v29, %v1049_v24  ;;  %v1060_v50 = vadd.f32 %v1058_v3, %v1050_v26 }
 0x711   :  { %v1069_v48 = vadd.f32 %v1067_v28, %v1059_v52  ;;  %v1070_v4 = vadd.f32 %v1068_v17, %v1060_v50  ;;  %v1358_v52 = vld [vmem:[#allocation9] sm:$0x1] }
 0x713   :  { %1075 = vrot.lane.b32.xlu1 %v1070_v4, %s1645_s8  ;;  %1073 = vrot.lane.b32.xlu0 %v1069_v48, %s1645_s8 }
 0x785   :  { %v1076_v57 = vpop.permute.xlu1 %1075  ;;  %v1074_v45 = vpop.permute.xlu0 %1073 }
 0x786   :  { %1080 = vst.msk [vmem:[#allocation6 + $0x8] sm:$0xff] %vm211_vm9, %v1076_v57  ;;  %1079 = vst.msk [vmem:[#allocation6] sm:$0xff] %vm211_vm9, %v1074_v45 }
 0x78d   :  { %v1082_v18 = vld [vmem:[#allocation6 + $0x8] sm:$0xff]  ;;  %v1081_v47 = vld [vmem:[#allocation6] sm:$0xff] }
 0x78e   :  { %1104 = vst.msk [vmem:[#allocation4 + $0x18] sm:$0xff] %vm209_vm8, %v1082_v18  ;;  %1093 = vrot.lane.b32.xlu0 %v1082_v18, %s1639_s2  ;;  %1091 = vrot.lane.b32.xlu1 %v1081_v47, %s1639_s2  ;;  %1103 = vst.msk [vmem:[#allocation4 + $0x10] sm:$0xff] %vm209_vm8, %v1081_v47 }
 0x78f   :  { %1106 = vst.msk [vmem:[#allocation4 + $0x18] sm:$0xff] %vm211_vm9, %v1082_v18  ;;  %1105 = vst.msk [vmem:[#allocation4 + $0x10] sm:$0xff] %vm211_vm9, %v1081_v47 }
 0x792   :  { %1109 = vrot.lane.b32.xlu0 %v1082_v18, %s1641_s25  ;;  %1107 = vrot.lane.b32.xlu1 %v1081_v47, %s1641_s25 }
 0x796   :  { %1129 = vperm.xlu1 %1548, %v1126_v61   ;;  %v1121_v60 = vld [vmem:[#allocation4 + $0x10] sm:$0xff]  ;;  %v1122_v51 = vld [vmem:[#allocation4 + $0x18] sm:$0xff] }
 0x797   :  { %v1456_v33 = vpack.c.bf16 %v1122_v51, %v1121_v60 }
 0x800   :  { %v1092_v34 = vpop.permute.xlu1 %1091  ;;  %v1094_v55 = vpop.permute.xlu0 %1093 }
 0x801   :  { %1098 = vst.msk [vmem:[#allocation4] sm:$0xff] %vm1097_vm0, %v1092_v34  ;;  %1099 = vst.msk [vmem:[#allocation4 + $0x8] sm:$0xff] %vm1097_vm0, %v1094_v55 }
 0x802   :  { %1101 = vst.msk [vmem:[#allocation4] sm:$0xff] %vm1100_vm2, %v1092_v34  ;;  %1102 = vst.msk [vmem:[#allocation4 + $0x8] sm:$0xff] %vm1100_vm2, %v1094_v55 }
 0x804   :  { %v1108_v12 = vpop.permute.xlu1 %1107  ;;  %v1110_v22 = vpop.permute.xlu0 %1109 }
 0x805   :  { %1114 = vst.msk [vmem:[#allocation4 + $0x20] sm:$0xff] %vm1113_vm4, %v1108_v12  ;;  %1115 = vst.msk [vmem:[#allocation4 + $0x28] sm:$0xff] %vm1113_vm4, %v1110_v22 }
 0x806   :  { %1117 = vst.msk [vmem:[#allocation4 + $0x20] sm:$0xff] %vm1116_vm5, %v1108_v12  ;;  %1118 = vst.msk [vmem:[#allocation4 + $0x28] sm:$0xff] %vm1116_vm5, %v1110_v22 }
 0x809   :  { %v1119_v5 = vld [vmem:[#allocation4] sm:$0xff]  ;;  %v1120_v20 = vld [vmem:[#allocation4 + $0x8] sm:$0xff] }
 0x80a   :  { %v1453_v2 = vpack.c.bf16 %v1120_v20, %v1119_v5 }
 0x80c   :  { %1454 = vmatpush3.bf16.msra.mxu1 %v1453_v2 }
 0x80d   :  { %1455 = vmatprep.subr.bf16.mxu1 %v1646_v59  ;;  %v1123_v10 = vld [vmem:[#allocation4 + $0x20] sm:$0xff]  ;;  %v1124_v6 = vld [vmem:[#allocation4 + $0x28] sm:$0xff] }
 0x80e   :  { %v1459_v62 = vpack.c.bf16 %v1124_v6, %v1123_v10 }
 0x810   :  { %1457 = vmatpush3.bf16.msra.mxu1 %v1456_v33 }
 0x811   :  { %1458 = vmatprep.subr.bf16.mxu1 %v1646_v59  ;;  %v1350_v59 = vld [vmem:[#allocation8] sm:$0x1] }
 0x814   :  { %1460 = vmatpush3.bf16.msra.mxu1 %v1459_v62 }
 0x815   :  { %v1130_v13 = vpop.permute.xlu1 %1129 }
 0x817   :  { %1437 = vmatmul.mubr.msk.f32.vlgmr.msra.gmra.mrb[0].mxu1 %vm1132_vm6, %v1125_v11 }
 0x8ea   :  { %v1202_v38 = vpop.f32.mrb[0].mxu1 }
 0x8eb   :  { %v1203_v37 = vadd.f32 %v1202_v38, %v1130_v13  ;;  %v1438_v32 = vpop.f32.mrb[1].mxu1 }
 0x8ed   :  { %v1206_v14 = vsel %vm169_vm3, %v1203_v37, 0.0 }
 0x8ee   :  { %1207 = vadd.xlane.f32.xlu0 %v1206_v14 }
 0x97b   :  { %v1208_v63 = vpop.xlane.xlu0 %1207 }
 0x97c   :  { %v1209_v43 = vmul.f32 0.03125, %v1208_v63 }
 0x97e   :  { %v1210_v54 = vsub.f32 %v1203_v37, %v1209_v43 }
 0x980   :  { %v1211_v16 = vmul.f32 %v1210_v54, %v1210_v54 }
 0x982   :  { %v1212_v21 = vsel %vm169_vm3, %v1211_v16, 0.0  ;;  %vm1337_vm3 = vcmask 253952  }
 0x983   :  { %1213 = vadd.xlane.f32.xlu1 %v1212_v21 }
 0x994   :  { %1229 = vperm.xlu1 %1548, %v1226_v23  }
 0xa10   :  { %v1214_v44 = vpop.xlane.xlu1 %1213 }
 0xa11   :  { %v1215_v30 = vmul.f32 0.03125, %v1214_v44 }
 0xa13   :  { %v1216_v56 = vadd.f32 1e-05, %v1215_v30 }
 0xa14   :  { %v1230_v39 = vpop.permute.xlu1 %1229 }
 0xa15   :  { %1556 = vrsqrt.f32 %v1216_v56 }
 0xa1f   :  { %v1557_v19 = vpop.eup %1556 }
 0xa20   :  { %v1219_v53 = vmul.f32 %v1557_v19, %v1218_v31 }
 0xa22   :  { %1222 = vperm.xlu0 %1549, %v1219_v53  }
 0xaa1   :  { %v1223_v9 = vpop.permute.xlu0 %1222 }
 0xaa2   :  { %v1225_v41 = vmul.f32 %v1223_v9, %v1210_v54 }
 0xaa4   :  { %v1232_v36 = vadd.f32 %v1230_v39, %v1225_v41 }
 0xaa6   :  { %v1233_v27 = vmax.f32 %v1232_v36, 0.0 }
 0xaa8   :  { %1243 = vst.msk [vmem:[#allocation5 + $0x8] sm:$0xff] %vm209_vm8, %v1233_v27  ;;  %1245 = vrot.lane.b32.xlu1 %v1233_v27, %s1643_s15  ;;  %1238 = vrot.lane.b32.xlu0 %v1233_v27, %s1642_s22  ;;  %s1382_s22 = sshll.u32 %s1648_s13, 4  ;;  %s1383_s22 = int_to_ptr.vmem [resolvable:$true] %s1382_s22 }
 0xaa9   :  { %1244 = vst.msk [vmem:[#allocation5 + $0x8] sm:$0xff] %vm211_vm9, %v1233_v27  ;;  %s1604_s15 = scalar_lea.vmem %s1383_s22, 32  ;;  %p1609_p3 = scmp.lt.s32.totalorder %s1383_s22, %s1383_s22 }
 0xaaa   :  { %p1605_p2 = scmp.ne.s32.totalorder %s1383_s22, %s1604_s15  ;;  %p1610_p4 = scmp.lt.s32.totalorder %s1604_s15, %s1604_s15 }
 0xaac   :  { %1257 = vperm.xlu0 %1549, %v1254_v40   ;;  %p1611_p5 = por %p1610_p4, %p1609_p3 }
 0xaae   :  { %p1612_p6 = pnand %p1611_p5, %p1605_p2 }
 0xab0   :  { %v1251_v58 = vld [vmem:[#allocation5 + $0x8] sm:$0xff] }
 0xb1a   :  { %v1246_v35 = vpop.permute.xlu1 %1245  ;;  %v1239_v15 = vpop.permute.xlu0 %1238 }
 0xb1b   :  { %1248 = vst.msk [vmem:[#allocation5 + $0x10] sm:$0xff] %vm216_vm13, %v1246_v35 }
 0xb1c   :  { %1241 = vst.msk [vmem:[#allocation5] sm:$0xff] %vm205_vm11, %v1239_v15 }
 0xb1d   :  { %1249 = vst.msk [vmem:[#allocation5 + $0x10] sm:$0xff] %vm218_vm14, %v1246_v35 }
 0xb1e   :  { %1242 = vst.msk [vmem:[#allocation5] sm:$0xff] %vm207_vm12, %v1239_v15 }
 0xb24   :  { %v1252_v42 = vld [vmem:[#allocation5 + $0x10] sm:$0xff] }
 0xb25   :  { %v1250_v0 = vld [vmem:[#allocation5] sm:$0xff] }
 0xb26   :  { %v1462_v25 = vpack.c.bf16 %v1251_v58, %v1250_v0 }
 0xb28   :  { %1463 = vmatpush3.bf16.msra.mxu0 %v1462_v25 }
 0xb29   :  { %1443 = vmatprep.subr.mxu0 %v1638_v7 }
 0xb2b   :  { %v1258_v1 = vpop.permute.xlu0 %1257 }
 0xb2c   :  { %1444 = vmatpush3.msra.mxu0 %v1252_v42  ;;  %v1263_v49 = vrot.slane %v1258_v1, %v1796_v8 }
 0xb2d   :  { %1446 = vmatmul.mubr.msk.f32.vlgmr.msra.gmra.mrb[2].mxu0 %vm237_vm10, %v1253_v46 }
 0xc00   :  { %v1333_v24 = vpop.f32.mrb[2].mxu0 }
 0xc01   :  { %v1334_v26 = vadd.f32 %v1333_v24, %v1263_v49  ;;  %v1447_v29 = vpop.f32.mrb[3].mxu0 }
 0xc03   :  { %v1338_v3 = vsel %vm1337_vm3, %v1334_v26, 0.0 }
 0xc04   :  { %1339 = vadd.xlane.f32.xlu1 %v1338_v3 }
 0xc15   :  { %1361 = vperm.xlu1 %1548, %v1358_v52  }
 0xc91   :  { %v1340_v7 = vpop.xlane.xlu1 %1339 }
 0xc92   :  { %v1341_v50 = vmul.f32 0.03125, %v1340_v7 }
 0xc94   :  { %v1342_v28 = vsub.f32 %v1334_v26, %v1341_v50 }
 0xc95   :  { %v1362_v61 = vpop.permute.xlu1 %1361 }
 0xc96   :  { %v1343_v17 = vmul.f32 %v1342_v28, %v1342_v28  ;;  %v1367_v55 = vrot.slane %v1362_v61, %v1796_v8 }
 0xc98   :  { %v1344_v48 = vsel %vm1337_vm3, %v1343_v17, 0.0 }
 0xc99   :  { %1345 = vadd.xlane.f32.xlu0 %v1344_v48 }
 0xd26   :  { %v1346_v4 = vpop.xlane.xlu0 %1345 }
 0xd27   :  { %v1347_v57 = vmul.f32 0.03125, %v1346_v4 }
 0xd29   :  { %v1348_v45 = vadd.f32 1e-05, %v1347_v57 }
 0xd2b   :  { %1558 = vrsqrt.f32 %v1348_v45 }
 0xd35   :  { %v1559_v18 = vpop.eup %1558 }
 0xd36   :  { %v1351_v47 = vmul.f32 %v1559_v18, %v1350_v59 }
 0xd38   :  { %1354 = vperm.xlu0 %1549, %v1351_v47  }
 0xdb7   :  { %v1355_v34 = vpop.permute.xlu0 %1354 }
 0xdb8   :  { %v1357_v12 = vmul.f32 %v1355_v34, %v1342_v28 }
 0xdba   :  { %v1368_v22 = vadd.f32 %v1367_v55, %v1357_v12 }
 0xdbc   :  { %v1369_v5 = vmax.f32 %v1368_v22, 0.0 }
 0xdbe   :  { %1370 = vst.msk [vmem:[#allocation15] sm:$0x1] %vm118_vm1, %v1369_v5  ;;  %1372 = vrot.lane.b32.xlu1 %v1369_v5, %s1644_s7 }
 0xe30   :  { %v1373_v20 = vpop.permute.xlu1 %1372 }
 0xe31   :  { %1376 = vst.msk [vmem:[#allocation15 + $0x1] sm:$0x1] %vm118_vm1, %v1373_v20 }
 0xe32   :  { %1615 = shalt.err (!%p1612_p6)
}
 0xe33   :  { %s1616_s24 = scalar_lea.hbm %s2295_s21, 32 }
 0xe34   :  { %p1617_p7 = scmp.ne.s32.totalorder %s2295_s21, %s1616_s24  ;;  %p1620_p8 = scmp.lt.u32.totalorder %s1616_s24, %s2295_s21 }
 0xe36   :  { %p1622_p9 = pnand %p1620_p8, %p1617_p7 }
 0xe38   :  { %1625 = shalt.err (!%p1622_p9)
}
 0xe39   :  { %1388 = dma.vmem_to_hbm [thread:$0]  %s1383_s22, 32, %s2295_s21, [#allocation12], %s1645_s8, %s1645_s8, %s1639_s2  }
 0xe3a   :  { %1630 = dma.done.wait [#allocation12], 32  }
 0xe3b   :  { %1631 = vsyncadd [#allocation12], 4294967264 }
 0xe3c   :  { %1392 = vsyncpa [#allocation11], 1 }
 0xe3d   :  { %1393 = vsyncpa [#allocation14], 1 }
 0xe3e   :  { %1394 = vsyncpa [#allocation12], 1 }

</bundles_post_ra>
